<compile_context>
chip_gen: v5e
topology: v5e:2x2
jax: 0.10.0
libtpu: 0.0.40
codegen_flags: <defaults>
</compile_context>

<pallas_src>
import functools
import math

import jax
import jax.numpy as jnp
from jax import lax
from jax.experimental import pallas as pl
from jax.experimental.pallas import tpu as pltpu

EPS = 1e-5


# ------------------------------- fused kernel --------------------------------
def _fused_db1_kernel(xa_ref, xb_ref, w1_ref, b1_ref, wcat_ref, b2_ref, o_ref,
                      y1_ref, *, W, TH, C):
    """One (batch, row-tile) grid step.

    xa_ref  : (1, TH, Wp, Cin) bf16   padded-input rows [r*TH, r*TH+TH)
    xb_ref  : (1, 4,  Wp, Cin) bf16   padded-input rows [(r+1)*TH, (r+1)*TH+4)  (bottom halo)
    w1_ref  : (Cin, C)   bf16         BN-folded 1x1 conv weight
    wcat_ref: (3C, 3C)   bf16         BN-folded dilated-3x3 weight, K=(kw,cin), N=(kh,cout)
    b1_ref / b2_ref : (1, C) f32      BN shifts (biases)
    o_ref   : (1, TH, W, C) f32
    y1_ref  : (TH+4, Wp, C) bf16      VMEM scratch: stage-1 output slab (incl. halo rows)
    """
    r = pl.program_id(1)
    last = pl.num_programs(1) - 1
    Wp = W + 4

    # Columns 0,1 and W+2,W+3 of the slab are conv1-output padding.  The module zero-pads
    # AFTER conv1+BN+ReLU, so relu(b1) computed on padded input pixels must be forced back
    # to 0.  Narrow column mask only; row padding is handled with pl.when on edge tiles.
    col = lax.broadcasted_iota(jnp.int32, (1, Wp, 1), 1)
    col_ok = (col >= 2) & (col < W + 2)

    # ---- stage 1: 1x1 conv (+folded BN) + ReLU -----------------------------------
    # Main TH rows and the 4-row bottom halo are computed with two separate dots and
    # written straight into the slab scratch (no in-kernel row concatenate of x).
    y_main = lax.dot_general(xa_ref[0], w1_ref[...], (((2,), (0,)), ((), ())),
                             preferred_element_type=jnp.float32)           # (TH, Wp, C)
    y1_ref[0:TH] = jnp.where(col_ok, jnp.maximum(y_main + b1_ref[...], 0.0),
                             0.0).astype(jnp.bfloat16)
    y_halo = lax.dot_general(xb_ref[0], w1_ref[...], (((2,), (0,)), ((), ())),
                             preferred_element_type=jnp.float32)           # (4, Wp, C)
    y1_ref[TH:TH + 4] = jnp.where(col_ok, jnp.maximum(y_halo + b1_ref[...], 0.0),
                                  0.0).astype(jnp.bfloat16)

    @pl.when(r == 0)          # the 2 top padded rows exist only on the first row tile
    def _():
        y1_ref[0:2] = jnp.zeros((2, Wp, C), jnp.bfloat16)

    @pl.when(r == last)       # the 2 bottom padded rows exist only on the last row tile
    def _():
        y1_ref[TH + 2:TH + 4] = jnp.zeros((2, Wp, C), jnp.bfloat16)

    # ---- stage 2: 3x3 dilated(2) conv (+folded BN) + ReLU -------------------------
    # kw taps packed along K (K = 3C) and kh taps packed along N (N = 3C): one deep/wide
    # MXU matmul.  The kh partials are then combined with three row-shifted 64-lane
    # slices on the VPU before the bias / ReLU / store.
    y1s = y1_ref[...]
    y1cat = jnp.concatenate([y1s[:, 0:W], y1s[:, 2:2 + W], y1s[:, 4:4 + W]], axis=-1)
    y = lax.dot_general(y1cat, wcat_ref[...], (((2,), (0,)), ((), ())),
                        preferred_element_type=jnp.float32)                # (TH+4, W, 3C)
    z = y[0:TH, :, 0:C] + y[2:TH + 2, :, C:2 * C] + y[4:TH + 4, :, 2 * C:3 * C]
    o_ref[0] = jnp.maximum(z + b2_ref[...], 0.0).astype(o_ref.dtype)


# ------------------------------ tiling helpers --------------------------------
def _pad8(n):
    return -(-n // 8) * 8


def _pad128(n):
    return -(-n // 128) * 128


def _step_bytes(th, W, Cin, C):
    """Per-grid-step VMEM working set, (8,128)-layout aware, incl. double buffers."""
    Wp, bf, f32 = W + 4, 2, 4
    xa = 2 * th * _pad8(Wp) * _pad128(Cin) * bf            # main input block (lane-padded Cin!)
    xb = 2 * 4 * _pad8(Wp) * _pad128(Cin) * bf              # 4-row halo block
    out = 2 * th * _pad8(W) * _pad128(C) * f32              # output block
    wts = 2 * (_pad8(Cin) * _pad128(C) * bf
               + _pad8(3 * C) * _pad128(3 * C) * bf
               + 2 * _pad8(1) * _pad128(C) * f32)           # resident weights / biases
    y1s = (th + 4) * _pad8(Wp) * _pad128(C) * bf            # y1 slab scratch
    y1cat = (th + 4) * _pad8(W) * _pad128(3 * C) * bf       # stage-2 lhs (live value / spill)
    ymm = (th + 4) * _pad8(W) * _pad128(3 * C) * f32        # stage-2 f32 result (live / spill)
    return xa + xb + out + wts + y1s + y1cat + ymm


def _vmem_capacity_bytes():
    try:
        return int(pltpu.get_tpu_info().vmem_capacity_bytes)
    except Exception:
        return 64 * 1024 * 1024  # conservative fallback (v7x per-core VMEM)


def _pick_tile_h(H, W, Cin, C, n_batch, budget_bytes):
    """Largest multiple-of-4 divisor of H whose working set fits the per-chip budget."""
    cands = [d for d in range(4, H + 1, 4) if H % d == 0]
    if not cands:
        raise ValueError("H must be a multiple of 4")  # TODO(synk): pad / handle general H
    fitting = [d for d in cands if _step_bytes(d, W, Cin, C) <= budget_bytes] or [min(cands)]

    def best(cs):
        m8 = [d for d in cs if d % 8 == 0]   # prefer sublane-aligned row tiles
        return max(m8) if m8 else max(cs)

    th = best(fitting)
    # v7x has 2 TensorCores: expose >= 2 parallel grid steps when possible.
    if n_batch * (H // th) < 2:
        multi = [d for d in fitting if n_batch * (H // d) >= 2]
        if multi:
            th = best(multi)
    return th


# ---------------------------------- wrapper ------------------------------------
def db1_forward(x_nchw, params, *, tile_h=None):
    w1, scale1, shift1, w2, scale2, shift2 = params
    N, Cin, H, W = x_nchw.shape
    C = w1.shape[1]  # 64
    if H % 4 != 0:
        raise ValueError("H must be a multiple of 4")  # TODO(synk): general H support

    cap = _vmem_capacity_bytes()
    budget = max(8 * 1024 * 1024,
                 min(int(0.6 * cap), cap - 24 * 1024 * 1024))   # ~38 MiB v7x, ~77 MiB v5e/v6e
    TH = _pick_tile_h(H, W, Cin, C, N, budget) if tile_h is None else tile_h
    if H % TH != 0 or TH % 4 != 0 or TH < 4:
        raise ValueError("tile_h must divide H and be a positive multiple of 4")
    R = H // TH
    Wp = W + 4
    th4 = TH // 4

    # Fold inference BatchNorm into the conv weights; keep the shifts as biases.
    w1f = (w1 * scale1).astype(jnp.bfloat16)                       # (Cin, C)
    w2f = (w2 * scale2[0, 0]).astype(jnp.bfloat16)                 # (3, 3, C, C) (kh,kw,ci,co)
    # Wcat[kw*C+ci, kh*C+co] = w2f[kh,kw,ci,co]: kw taps along K, kh taps along N.
    wcat = jnp.transpose(w2f, (1, 2, 0, 3)).reshape(3 * C, 3 * C)  # (3C, 3C)
    b1 = shift1.reshape(1, C).astype(jnp.float32)
    b2 = shift2.reshape(1, C).astype(jnp.float32)

    # NHWC bf16 operands, 2-pixel spatial zero pad (Hp = H + 4: 2 top + 2 bottom).
    x_nhwc = jnp.transpose(x_nchw, (0, 2, 3, 1)).astype(jnp.bfloat16)
    x_p = jnp.pad(x_nhwc, ((0, 0), (2, 2), (2, 2), (0, 0)))

    # Real footprint (already includes double-buffering) + margin, bounded per generation.
    vmem_limit = int(min(cap - 16 * 1024 * 1024,
                         max(_step_bytes(TH, W, Cin, C) + 8 * 1024 * 1024,
                             32 * 1024 * 1024)))

    kernel = functools.partial(_fused_db1_kernel, W=W, TH=TH, C=C)
    z = pl.pallas_call(
        kernel,
        out_shape=jax.ShapeDtypeStruct((N, H, W, C), jnp.float32),
        grid=(N, R),
        in_specs=[
            pl.BlockSpec((1, TH, Wp, Cin), lambda n, r: (n, r, 0, 0)),            # main rows
            pl.BlockSpec((1, 4, Wp, Cin), lambda n, r: (n, (r + 1) * th4, 0, 0)),  # 4-row halo
            pl.BlockSpec((Cin, C), lambda n, r: (0, 0)),                           # resident w1
            pl.BlockSpec((1, C), lambda n, r: (0, 0)),                             # resident b1
            pl.BlockSpec((3 * C, 3 * C), lambda n, r: (0, 0)),                     # resident w2
            pl.BlockSpec((1, C), lambda n, r: (0, 0)),                             # resident b2
        ],
        out_specs=pl.BlockSpec((1, TH, W, C), lambda n, r: (n, r, 0, 0)),
        scratch_shapes=[pltpu.VMEM((TH + 4, Wp, C), jnp.bfloat16)],                # y1 slab
        compiler_params=pltpu.CompilerParams(
            dimension_semantics=("parallel", "parallel"),
            vmem_limit_bytes=vmem_limit,
        ),
    )(x_p, x_p, w1f, b1, wcat, b2)

    z_nchw = jnp.transpose(z, (0, 3, 1, 2))
    return (z_nchw, z_nchw)  # DB1 returns (z, z)


# --------------------------- deterministic params ------------------------------
def init_params(key, inplanes, outplanes=64):
    assert outplanes == 64, "DB1 hard-codes BatchNorm2d(64)"
    k1, k2 = jax.random.split(key)
    # conv1: kaiming-normal fan_in = inplanes, bias = 0
    w1 = jax.random.normal(k1, (inplanes, 64), jnp.float32) * math.sqrt(2.0 / inplanes)
    # conv2: kaiming-normal fan_in = 64*3*3, bias = 0 ; layout (kh, kw, Cin, Cout)
    w2 = jax.random.normal(k2, (3, 3, 64, 64), jnp.float32) * math.sqrt(2.0 / (64 * 9))
    # BN (gamma=1, beta=0, mean=0, var=1): scale = 1/sqrt(1+eps), shift = 0
    bn_scale = jnp.float32(1.0 / math.sqrt(1.0 + EPS))
    scale1 = jnp.full((1, 64), bn_scale, jnp.float32)
    shift1 = jnp.zeros((1, 64), jnp.float32)
    scale2 = jnp.full((1, 1, 64), bn_scale, jnp.float32)
    shift2 = jnp.zeros((1, 1, 64), jnp.float32)
    return (w1, scale1, shift1, w2, scale2, shift2)


# -------------------------- references (pure JAX) ------------------------------
def db1_reference(x_nchw, params):
    """Same numerics as the kernel: bf16 matmul operands, f32 accumulation."""
    w1, scale1, shift1, w2, scale2, shift2 = params
    N, Cin, H, W = x_nchw.shape
    C = w1.shape[1]
    w1f = (w1 * scale1).astype(jnp.bfloat16)
    w2f = (w2 * scale2[0, 0]).astype(jnp.bfloat16)
    b1 = shift1.reshape(1, 1, 1, C)
    b2 = shift2.reshape(1, 1, 1, C)
    x = jnp.transpose(x_nchw, (0, 2, 3, 1)).astype(jnp.bfloat16)
    y1 = lax.dot_general(x, w1f, (((3,), (0,)), ((), ())),
                         preferred_element_type=jnp.float32)
    y1 = jnp.maximum(y1 + b1, 0.0)
    y1p = jnp.pad(y1, ((0, 0), (2, 2), (2, 2), (0, 0))).astype(jnp.bfloat16)
    acc = jnp.zeros((N, H, W, C), jnp.float32)
    for kh in range(3):
        for kw in range(3):
            patch = y1p[:, kh * 2:kh * 2 + H, kw * 2:kw * 2 + W, :]
            acc = acc + lax.dot_general(patch, w2f[kh, kw], (((3,), (0,)), ((), ())),
                                        preferred_element_type=jnp.float32)
    z = jnp.maximum(acc + b2, 0.0)
    return jnp.transpose(z, (0, 3, 1, 2))


def db1_reference_f32(x_nchw, params):
    """Full-f32 module numerics (loose check that bf16 stays faithful)."""
    w1, scale1, shift1, w2, scale2, shift2 = params
    x = jnp.transpose(x_nchw, (0, 2, 3, 1)).astype(jnp.float32)
    y1 = jnp.maximum(jnp.einsum("nhwc,cd->nhwd", x, w1) * scale1[0] + shift1[0], 0.0)
    y2 = lax.conv_general_dilated(
        y1, w2, window_strides=(1, 1), padding=[(2, 2), (2, 2)],
        rhs_dilation=(2, 2), dimension_numbers=("NHWC", "HWIO", "NHWC"))
    z = jnp.maximum(y2 * scale2[0, 0] + shift2[0, 0], 0.0)
    return jnp.transpose(z, (0, 3, 1, 2))


if __name__ == "__main__":
    key = jax.random.PRNGKey(0)
    kx, kp = jax.random.split(key)

    N, inplanes, H, W = 2, 4, 16, 16
    x = jax.random.normal(kx, (N, inplanes, H, W), jnp.float32)  # NCHW like PyTorch
    params = init_params(kp, inplanes, 64)

    # exercise the multi-row-tile path (grid = (N, 2)) and the auto-picked tile (grid = (N, 1))
    z1, z2 = db1_forward(x, params, tile_h=8)
    jax.block_until_ready((z1, z2))
    z1_auto, _ = db1_forward(x, params)
    jax.block_until_ready(z1_auto)

    ref = db1_reference(x, params)          # bf16-matmul / f32-accumulate numerics
    ref_f32 = db1_reference_f32(x, params)  # full-f32 module numerics

    assert z1.shape == (N, 64, H, W) and z2.shape == (N, 64, H, W)
    assert jnp.allclose(z1, ref, atol=2e-3, rtol=2e-3)
    assert jnp.allclose(z2, ref, atol=2e-3, rtol=2e-3)
    assert jnp.allclose(z1_auto, ref, atol=2e-3, rtol=2e-3)
    assert jnp.allclose(z1, ref_f32, atol=1e-1, rtol=1e-1)

    print("KERNEL_OK")
</pallas_src>

<mosaic_0001>
module attributes {stable_mosaic.version = 11 : i64} {
  func.func @_fused_db1_kernel(%arg0: i32, %arg1: i32, %arg2: memref<1x8x20x4xbf16, #tpu.memory_space<vmem>>, %arg3: memref<1x4x20x4xbf16, #tpu.memory_space<vmem>>, %arg4: memref<4x64xbf16, #tpu.memory_space<vmem>>, %arg5: memref<1x64xf32, #tpu.memory_space<vmem>>, %arg6: memref<192x192xbf16, #tpu.memory_space<vmem>>, %arg7: memref<1x64xf32, #tpu.memory_space<vmem>>, %arg8: memref<1x8x16x64xf32, #tpu.memory_space<vmem>>, %arg9: memref<12x20x64xbf16, #tpu.memory_space<vmem>>) attributes {dimension_semantics = [#tpu.dimension_semantics<parallel>, #tpu.dimension_semantics<parallel>], iteration_bounds = array<i64: 2, 2>, scalar_prefetch = 0 : i64, scratch_operands = 1 : i64, tpu.core_type = #tpu.core_type<tc>, window_params = [{transform_indices = @transform_0, window_bounds = array<i64: 1, 8, 20, 4>}, {transform_indices = @transform_1, window_bounds = array<i64: 1, 4, 20, 4>}, {pipeline_mode = #tpu.pipeline_mode<synchronous>, transform_indices = @transform_2, window_bounds = array<i64: 4, 64>}, {pipeline_mode = #tpu.pipeline_mode<synchronous>, transform_indices = @transform_3, window_bounds = array<i64: 1, 64>}, {pipeline_mode = #tpu.pipeline_mode<synchronous>, transform_indices = @transform_4, window_bounds = array<i64: 192, 192>}, {pipeline_mode = #tpu.pipeline_mode<synchronous>, transform_indices = @transform_5, window_bounds = array<i64: 1, 64>}, {transform_indices = @transform_6, window_bounds = array<i64: 1, 8, 16, 64>}]} {
    %0 = tpu.iota {dimensions = array<i32: 1>} : vector<1x20x1xi32>
    %c2_i32 = arith.constant 2 : i32
    %1 = vector.broadcast %c2_i32 : i32 to vector<1x20x1xi32>
    %2 = arith.cmpi sge, %0, %1 : vector<1x20x1xi32>
    %c18_i32 = arith.constant 18 : i32
    %3 = vector.broadcast %c18_i32 : i32 to vector<1x20x1xi32>
    %4 = arith.cmpi slt, %0, %3 : vector<1x20x1xi32>
    %5 = arith.andi %2, %4 : vector<1x20x1xi1>
    %c0 = arith.constant 0 : index
    %c0_0 = arith.constant 0 : index
    %c0_1 = arith.constant 0 : index
    %c0_2 = arith.constant 0 : index
    %6 = vector.load %arg2[%c0, %c0_0, %c0_1, %c0_2] : memref<1x8x20x4xbf16, #tpu.memory_space<vmem>>, vector<1x8x20x4xbf16>
    %7 = vector.shape_cast %6 : vector<1x8x20x4xbf16> to vector<8x20x4xbf16>
    %c0_3 = arith.constant 0 : index
    %c0_4 = arith.constant 0 : index
    %8 = vector.load %arg4[%c0_3, %c0_4] : memref<4x64xbf16, #tpu.memory_space<vmem>>, vector<4x64xbf16>
    %cst = arith.constant dense<0.000000e+00> : vector<8x20x64xf32>
    %9 = tpu.matmul %7, %8, %cst {dimension_numbers = #tpu.dot_dimension_numbers<[2], [0], [0, 1], [1], [0, 0, 0, 1, 1, 1], [], []>} : vector<8x20x4xbf16>, vector<4x64xbf16>, vector<8x20x64xf32> -> vector<8x20x64xf32>
    %c0_5 = arith.constant 0 : index
    %c0_6 = arith.constant 0 : index
    %10 = vector.load %arg5[%c0_5, %c0_6] : memref<1x64xf32, #tpu.memory_space<vmem>>, vector<1x64xf32>
    %11 = vector.shape_cast %10 : vector<1x64xf32> to vector<1x1x64xf32>
    %12 = vector.broadcast %11 : vector<1x1x64xf32> to vector<8x20x64xf32>
    %13 = arith.addf %9, %12 : vector<8x20x64xf32>
    %cst_7 = arith.constant 0.000000e+00 : f32
    %14 = vector.broadcast %cst_7 : f32 to vector<8x20x64xf32>
    %15 = arith.maximumf %13, %14 : vector<8x20x64xf32>
    %cst_8 = arith.constant 0.000000e+00 : f32
    %16 = vector.shape_cast %5 : vector<1x20x1xi1> to vector<1x20x1xi1>
    %17 = vector.broadcast %16 : vector<1x20x1xi1> to vector<8x20x64xi1>
    %18 = vector.broadcast %cst_8 : f32 to vector<8x20x64xf32>
    %19 = arith.select %17, %15, %18 : vector<8x20x64xi1>, vector<8x20x64xf32>
    %20 = arith.truncf %19 : vector<8x20x64xf32> to vector<8x20x64xbf16>
    %c0_9 = arith.constant 0 : index
    %c0_10 = arith.constant 0 : index
    %c0_11 = arith.constant 0 : index
    %21 = vector.load %arg9[%c0_9, %c0_10, %c0_11] : memref<12x20x64xbf16, #tpu.memory_space<vmem>>, vector<8x20x64xbf16>
    tpu.vector_store %arg9[%c0_9, %c0_10, %c0_11], %20 {strides = array<i32>} : memref<12x20x64xbf16, #tpu.memory_space<vmem>>, vector<8x20x64xbf16>,
    %c0_12 = arith.constant 0 : index
    %c0_13 = arith.constant 0 : index
    %c0_14 = arith.constant 0 : index
    %c0_15 = arith.constant 0 : index
    %22 = vector.load %arg3[%c0_12, %c0_13, %c0_14, %c0_15] : memref<1x4x20x4xbf16, #tpu.memory_space<vmem>>, vector<1x4x20x4xbf16>
    %23 = vector.shape_cast %22 : vector<1x4x20x4xbf16> to vector<4x20x4xbf16>
    %c0_16 = arith.constant 0 : index
    %c0_17 = arith.constant 0 : index
    %24 = vector.load %arg4[%c0_16, %c0_17] : memref<4x64xbf16, #tpu.memory_space<vmem>>, vector<4x64xbf16>
    %cst_18 = arith.constant dense<0.000000e+00> : vector<4x20x64xf32>
    %25 = tpu.matmul %23, %24, %cst_18 {dimension_numbers = #tpu.dot_dimension_numbers<[2], [0], [0, 1], [1], [0, 0, 0, 1, 1, 1], [], []>} : vector<4x20x4xbf16>, vector<4x64xbf16>, vector<4x20x64xf32> -> vector<4x20x64xf32>
    %c0_19 = arith.constant 0 : index
    %c0_20 = arith.constant 0 : index
    %26 = vector.load %arg5[%c0_19, %c0_20] : memref<1x64xf32, #tpu.memory_space<vmem>>, vector<1x64xf32>
    %27 = vector.shape_cast %26 : vector<1x64xf32> to vector<1x1x64xf32>
    %28 = vector.broadcast %27 : vector<1x1x64xf32> to vector<4x20x64xf32>
    %29 = arith.addf %25, %28 : vector<4x20x64xf32>
    %cst_21 = arith.constant 0.000000e+00 : f32
    %30 = vector.broadcast %cst_21 : f32 to vector<4x20x64xf32>
    %31 = arith.maximumf %29, %30 : vector<4x20x64xf32>
    %cst_22 = arith.constant 0.000000e+00 : f32
    %32 = vector.shape_cast %5 : vector<1x20x1xi1> to vector<1x20x1xi1>
    %33 = vector.broadcast %32 : vector<1x20x1xi1> to vector<4x20x64xi1>
    %34 = vector.broadcast %cst_22 : f32 to vector<4x20x64xf32>
    %35 = arith.select %33, %31, %34 : vector<4x20x64xi1>, vector<4x20x64xf32>
    %36 = arith.truncf %35 : vector<4x20x64xf32> to vector<4x20x64xbf16>
    %c8 = arith.constant 8 : index
    %c0_23 = arith.constant 0 : index
    %c0_24 = arith.constant 0 : index
    %37 = vector.load %arg9[%c8, %c0_23, %c0_24] : memref<12x20x64xbf16, #tpu.memory_space<vmem>>, vector<4x20x64xbf16>
    tpu.vector_store %arg9[%c8, %c0_23, %c0_24], %36 {strides = array<i32>} : memref<12x20x64xbf16, #tpu.memory_space<vmem>>, vector<4x20x64xbf16>,
    %c0_i32 = arith.constant 0 : i32
    %38 = arith.cmpi eq, %arg1, %c0_i32 : i32
    %39 = arith.extui %38 : i1 to i32
    %c0_i32_25 = arith.constant 0 : i32
    %40 = arith.cmpi ne, %39, %c0_i32_25 : i32
    scf.if %40 {
      %cst_40 = arith.constant 0.000000e+00 : bf16
      %65 = vector.broadcast %cst_40 : bf16 to vector<2x20x64xbf16>
      %c0_41 = arith.constant 0 : index
      %c0_42 = arith.constant 0 : index
      %c0_43 = arith.constant 0 : index
      %66 = vector.load %arg9[%c0_41, %c0_42, %c0_43] : memref<12x20x64xbf16, #tpu.memory_space<vmem>>, vector<2x20x64xbf16>
      tpu.vector_store %arg9[%c0_41, %c0_42, %c0_43], %65 {strides = array<i32>} : memref<12x20x64xbf16, #tpu.memory_space<vmem>>, vector<2x20x64xbf16>,
    } else {
    }
    %c1_i32 = arith.constant 1 : i32
    %41 = arith.cmpi eq, %arg1, %c1_i32 : i32
    %42 = arith.extui %41 : i1 to i32
    %c0_i32_26 = arith.constant 0 : i32
    %43 = arith.cmpi ne, %42, %c0_i32_26 : i32
    scf.if %43 {
      %cst_40 = arith.constant 0.000000e+00 : bf16
      %65 = vector.broadcast %cst_40 : bf16 to vector<2x20x64xbf16>
      %c10 = arith.constant 10 : index
      %c0_41 = arith.constant 0 : index
      %c0_42 = arith.constant 0 : index
      %66 = vector.load %arg9[%c10, %c0_41, %c0_42] : memref<12x20x64xbf16, #tpu.memory_space<vmem>>, vector<2x20x64xbf16>
      tpu.vector_store %arg9[%c10, %c0_41, %c0_42], %65 {strides = array<i32>} : memref<12x20x64xbf16, #tpu.memory_space<vmem>>, vector<2x20x64xbf16>,
    } else {
    }
    %c0_27 = arith.constant 0 : index
    %c0_28 = arith.constant 0 : index
    %c0_29 = arith.constant 0 : index
    %44 = vector.load %arg9[%c0_27, %c0_28, %c0_29] : memref<12x20x64xbf16, #tpu.memory_space<vmem>>, vector<12x20x64xbf16>
    %45 = vector.extract_strided_slice %44 {offsets = [0, 0, 0], sizes = [12, 16, 64], strides = [1, 1, 1]} : vector<12x20x64xbf16> to vector<12x16x64xbf16>
    %46 = vector.extract_strided_slice %44 {offsets = [0, 2, 0], sizes = [12, 16, 64], strides = [1, 1, 1]} : vector<12x20x64xbf16> to vector<12x16x64xbf16>
    %47 = vector.extract_strided_slice %44 {offsets = [0, 4, 0], sizes = [12, 16, 64], strides = [1, 1, 1]} : vector<12x20x64xbf16> to vector<12x16x64xbf16>
    %48 = tpu.concatenate %45, %46, %47 in 2 : vector<12x16x64xbf16>, vector<12x16x64xbf16>, vector<12x16x64xbf16> -> vector<12x16x192xbf16>
    %c0_30 = arith.constant 0 : index
    %c0_31 = arith.constant 0 : index
    %49 = vector.load %arg6[%c0_30, %c0_31] : memref<192x192xbf16, #tpu.memory_space<vmem>>, vector<192x192xbf16>
    %cst_32 = arith.constant dense<0.000000e+00> : vector<12x16x192xf32>
    %50 = tpu.matmul %48, %49, %cst_32 {dimension_numbers = #tpu.dot_dimension_numbers<[2], [0], [0, 1], [1], [0, 0, 0, 1, 1, 1], [], []>} : vector<12x16x192xbf16>, vector<192x192xbf16>, vector<12x16x192xf32> -> vector<12x16x192xf32>
    %51 = vector.extract_strided_slice %50 {offsets = [0, 0, 0], sizes = [8, 16, 64], strides = [1, 1, 1]} : vector<12x16x192xf32> to vector<8x16x64xf32>
    %52 = vector.extract_strided_slice %50 {offsets = [2, 0, 64], sizes = [8, 16, 64], strides = [1, 1, 1]} : vector<12x16x192xf32> to vector<8x16x64xf32>
    %53 = arith.addf %51, %52 : vector<8x16x64xf32>
    %54 = vector.extract_strided_slice %50 {offsets = [4, 0, 128], sizes = [8, 16, 64], strides = [1, 1, 1]} : vector<12x16x192xf32> to vector<8x16x64xf32>
    %55 = arith.addf %53, %54 : vector<8x16x64xf32>
    %c0_33 = arith.constant 0 : index
    %c0_34 = arith.constant 0 : index
    %56 = vector.load %arg7[%c0_33, %c0_34] : memref<1x64xf32, #tpu.memory_space<vmem>>, vector<1x64xf32>
    %57 = vector.shape_cast %56 : vector<1x64xf32> to vector<1x1x64xf32>
    %58 = vector.broadcast %57 : vector<1x1x64xf32> to vector<8x16x64xf32>
    %59 = arith.addf %55, %58 : vector<8x16x64xf32>
    %cst_35 = arith.constant 0.000000e+00 : f32
    %60 = vector.broadcast %cst_35 : f32 to vector<8x16x64xf32>
    %61 = arith.maximumf %59, %60 : vector<8x16x64xf32>
    %c0_36 = arith.constant 0 : index
    %c0_37 = arith.constant 0 : index
    %c0_38 = arith.constant 0 : index
    %c0_39 = arith.constant 0 : index
    %62 = vector.load %arg8[%c0_36, %c0_37, %c0_38, %c0_39] : memref<1x8x16x64xf32, #tpu.memory_space<vmem>>, vector<1x8x16x64xf32>
    %63 = vector.shape_cast %62 : vector<1x8x16x64xf32> to vector<8x16x64xf32>
    %64 = vector.shape_cast %61 : vector<8x16x64xf32> to vector<1x8x16x64xf32>
    tpu.vector_store %arg8[%c0_36, %c0_37, %c0_38, %c0_39], %64 {strides = array<i32>} : memref<1x8x16x64xf32, #tpu.memory_space<vmem>>, vector<1x8x16x64xf32>,
    return
  }
  func.func @transform_0(%arg0: i32, %arg1: i32) -> (i32, i32, i32, i32) {
    %c0_i32 = arith.constant 0 : i32
    %c0_i32_0 = arith.constant 0 : i32
    %c0_i32_1 = arith.constant 0 : i32
    return %arg0, %arg1, %c0_i32, %c0_i32_0 : i32, i32, i32, i32
  }
  func.func @transform_1(%arg0: i32, %arg1: i32) -> (i32, i32, i32, i32) {
    %c1_i32 = arith.constant 1 : i32
    %0 = arith.addi %arg1, %c1_i32 : i32
    %c2_i32 = arith.constant 2 : i32
    %1 = arith.muli %0, %c2_i32 : i32
    %c0_i32 = arith.constant 0 : i32
    %c0_i32_0 = arith.constant 0 : i32
    %c0_i32_1 = arith.constant 0 : i32
    return %arg0, %1, %c0_i32, %c0_i32_0 : i32, i32, i32, i32
  }
  func.func @transform_2(%arg0: i32, %arg1: i32) -> (i32, i32) {
    %c0_i32 = arith.constant 0 : i32
    %c0_i32_0 = arith.constant 0 : i32
    %c0_i32_1 = arith.constant 0 : i32
    return %c0_i32, %c0_i32_0 : i32, i32
  }
  func.func @transform_3(%arg0: i32, %arg1: i32) -> (i32, i32) {
    %c0_i32 = arith.constant 0 : i32
    %c0_i32_0 = arith.constant 0 : i32
    %c0_i32_1 = arith.constant 0 : i32
    return %c0_i32, %c0_i32_0 : i32, i32
  }
  func.func @transform_4(%arg0: i32, %arg1: i32) -> (i32, i32) {
    %c0_i32 = arith.constant 0 : i32
    %c0_i32_0 = arith.constant 0 : i32
    %c0_i32_1 = arith.constant 0 : i32
    return %c0_i32, %c0_i32_0 : i32, i32
  }
  func.func @transform_5(%arg0: i32, %arg1: i32) -> (i32, i32) {
    %c0_i32 = arith.constant 0 : i32
    %c0_i32_0 = arith.constant 0 : i32
    %c0_i32_1 = arith.constant 0 : i32
    return %c0_i32, %c0_i32_0 : i32, i32
  }
  func.func @transform_6(%arg0: i32, %arg1: i32) -> (i32, i32, i32, i32) {
    %c0_i32 = arith.constant 0 : i32
    %c0_i32_0 = arith.constant 0 : i32
    %c0_i32_1 = arith.constant 0 : i32
    return %arg0, %arg1, %c0_i32, %c0_i32_0 : i32, i32, i32, i32
  }
}

</mosaic_0001>

<bundles_post_ra>
// kernel: tpu_custom_call.1
= control target key start
LH: loop header
LB: loop body
LE: loop exit
PB: predicated region body
PF: predicated region fallthrough
CT: control target
= control target key end

     0   :  { %s3903_s0 = inlined_call_operand.vmem [shape: bf16[2,20,20,4], index: 0, kind: input, shape index: {}]   ;;  %s3904_s1 = inlined_call_operand.vmem [shape: bf16[2,20,20,4], index: 1, kind: input, shape index: {}]   ;;  %s3905_s2 = inlined_call_operand.vmem [shape: bf16[4,64], index: 2, kind: input, shape index: {}]   ;;  %s3906_s3 = inlined_call_operand.vmem [shape: f32[1,64], index: 3, kind: input, shape index: {}]   ;;  %s3907_s4 = inlined_call_operand.vmem [shape: bf16[192,192], index: 4, kind: input, shape index: {}]   ;;  %s3908_s5 = inlined_call_operand.vmem [shape: f32[1,64], index: 5, kind: input, shape index: {}]   ;;  %s3909_s6 = inlined_call_operand.hbm [shape: f32[2,16,16,64], index: 6, kind: output, shape index: {}]  }
   0x1   :  { %3911 = sst [smem:[#allocation6_spill]] %s3903_s0 }
   0x2   :  { %11 = vsyncpa [#allocation4], 0 }
   0x3   :  { %13 = vsyncpa [#allocation4 + $0x1], 0  ;;  %s3004_s21 = smov 0   ;;  %s3006_s22 = smov 0  }
   0x4   :  { %s3008_s23 = smov 0   ;;  %s3010_s24 = smov 0  }
   0x5   :  { %s3012_s25 = smov 0   ;;  %s3014_s26 = smov 0  }
   0x6   :  { %s3016_s27 = smov 0   ;;  %s3018_s28 = smov 0  }
   0x7 LB: > { %s2531_s29 = sadd.s32 4294967295, %s2962_s28   ;;  %s2532_s30 = sadd.s32 4294967294, %s2962_s28   ;;  %s2962_s28 = sphi %s3018_s28, %s19_s28   ;;  %s2958_s27 = sphi %s3016_s27, %s3923_s27   ;;  %s2954_s26 = sphi %s3014_s26, %s3922_s26   ;;  %s2950_s25 = sphi %s3012_s25, %s3921_s25   ;;  %s2946_s24 = sphi %s3010_s24, %s3920_s24   ;;  %s2942_s23 = sphi %s3008_s23, %s3919_s23   ;;  %s2938_s22 = sphi %s3006_s22, %s3918_s22   ;;  %s2934_s21 = sphi %s3004_s21, %s3917_s21  }
   0x8   : > { %s28_s7 = sadd.s32 1, %s2954_s26  ;;  %s31_s8 = sadd.s32 1, %s2958_s27 }
   0x9   : > { %p29_p0 = scmp.ge.s32.totalorder %s28_s7, 2  ;;  %p194_p1 = scmp.ne.s32.totalorder %s2942_s23, %s2938_s22 }
   0xa   : > { %p195_p2 = scmp.eq.s32.totalorder %s2531_s29, 3  ;;  %p200_p5 = scmp.ne.s32.totalorder %s2938_s22, %s2934_s21 }
   0xb   : > { %s3925_s7 = smov (%p29_p0, %s28_s7), 0  ;;  %s3927_s8 = smov (!%p29_p0, %s31_s8), %s2958_s27 }
   0xc   : > { %s180_s9 = ssub.s32 %s2954_s26, %s3925_s7  ;;  %p3055_p3 = por %p195_p2, %p194_p1 }
   0xd   : > { %p33_p4 = scmp.ge.s32.totalorder %s3927_s8, 2  ;;  %p201_p6 = scmp.eq.s32.totalorder %s2532_s30, 3 }
   0xe   : > { %p2537_p7 = scmp.ge.s32.totalorder %s2962_s28, 1  ;;  %p273_p9 = scmp.lt.s32.totalorder %s2962_s28, 5 }
   0xf   : > { %s3929_s8 = smov (%p33_p4, %s3927_s8), 0  ;;  %p3064_p8 = por %p201_p6, %p200_p5 }
  0x10   : > { %s179_s12 = ssub.s32 %s2958_s27, %s3929_s8  ;;  %s184_s13 = sadd.s32 1, %s2942_s23 }
  0x11   : > { %s181_s14 = sor.u32 %s180_s9, %s179_s12  ;;  %p274_p10 = pnand %p2537_p7, %p273_p9 }
  0x12   : > { %p182_p11 = scmp.eq.s32.totalorder %s181_s14, 0  ;;  %s3910_s16 = sand.u32 (!%p274_p10), 1, %s2938_s22  }
  0x13   : > { %277 = sbr.rel (%p274_p10) target bundleno = 1047 (0x417), region = 44  ;;  %s3080_s19 = sshll.u32 (!%p274_p10), %s2946_s24, 3 }
  0x14   : > { %s3073_s15 = scalar_select %p182_p11, %s2942_s23, %s184_s13  }
  0x15   : > { %s3084_s20 = sshll.u32 (!%p274_p10), %s3910_s16, 7  ;;  %p331_p12 = scmp.lt.s32.totalorder (!%p274_p10), %s2950_s25, 1 }
  0x16   : > { %p333_p13 = scmp.lt.s32.totalorder (!%p274_p10), %s3080_s19, 19  ;;  %s3914_s0 = sld [smem:[#allocation6_spill]] (!%p274_p10) }
  0x17   : > { %p2559_p1 = scmp.ne.s32.totalorder (!%p274_p10), %s2946_s24, 0 }
  0x18   : > { %v400_v0 = vld [vmem:[%s3905_s2] sm:$0x3]  ;;  %vm452_vm0 = vcmask 1041408   ;;  %s3090_s29 = scalar_select %p331_p12, %s2950_s25, 1  ;;  %vm456_vm1 = vcmask 1043458   ;;  %vm735_vm2 = vcmask 31744  }
  0x19   : > { %v757_v1 = vsel %vm452_vm0, %v400_v0, 0  ;;  %s334_s30 = scalar_select %p333_p13, %s3080_s19, 19  ;;  %vm1107_vm3 = vcmask 519168   ;;  %vm1110_vm5 = vcmask 517120  }
  0x1a   : > { %766 = vmatpush.bf16.msra.mxu0 %v757_v1  ;;  %2782 = vmatpush.bf16.msra.mxu1 %v757_v1  ;;  %s2787_s9 = smul.u32 60, %s3090_s29 }
  0x1b   : > { %2783 = vmatpush.bf16.msra.mxu2 %v757_v1  ;;  %2784 = vmatpush.bf16.msra.mxu3 %v757_v1  ;;  %s2786_s12 = smul.u32 3, %s334_s30 }
  0x1d   : > { %s337_s13 = sadd.s32 %s2787_s9, %s2786_s12  ;;  %s2781_s12 = sadd.s32 8, %s3080_s19 }
  0x1e   : > { %s2540_s14 = sshll.u32 %s337_s13, 2  ;;  %p3252_p0 = scmp.lt.s32.totalorder %s2781_s12, 19 }
  0x1f   : > { %s3099_s16 = scalar_lea.vmem %s3914_s0, %s2540_s14 }
  0x20   : > { %v376_v2 = vld [vmem:[%s3099_s16] sm:$0xf]  ;;  %v377_v3 = vld [vmem:[%s3099_s16 + $0x4] sm:$0xf]  ;;  %v378_v4 = vld [vmem:[%s3099_s16 + $0x8] sm:$0x3] }
  0x21   : > { %v428_v5 = vrot.slane %v376_v2, 2  ;;  %v429_v6 = vrot.slane %v377_v3, 2  ;;  %v379_v7 = vld [vmem:[%s3099_s16 + $0xc] sm:$0xf]  ;;  %v380_v8 = vld [vmem:[%s3099_s16 + $0x10] sm:$0xf] }
  0x22   : > { %v430_v9 = vrot.slane %v378_v4, 2  ;;  %v431_v10 = vrot.slane %v379_v7, 2  ;;  %v432_v11 = vrot.slane %v380_v8, 2  ;;  %v382_v18 = vld [vmem:[%s3099_s16 + $0x18] sm:$0xf]  ;;  %s3931_s12 = smov (!%p3252_p0, %s2781_s12), 19 }
  0x23   : > { %v455_v12 = vsel %vm452_vm0, %v376_v2, %v428_v5  ;;  %v457_v13 = vsel %vm456_vm1, %v376_v2, %v428_v5  ;;  %v462_v14 = vsel %vm452_vm0, %v377_v3, %v429_v6  ;;  %v463_v15 = vsel %vm456_vm1, %v377_v3, %v429_v6  ;;  %v381_v21 = vld [vmem:[%s3099_s16 + $0x14] sm:$0x3]  ;;  %v383_v24 = vld [vmem:[%s3099_s16 + $0x1c] sm:$0xf]  ;;  %v384_v32 = vld [vmem:[%s3099_s16 + $0x20] sm:$0x3] }
  0x24   : > { %v459_v16 = vrot.slane %v457_v13, 2  ;;  %v465_v17 = vrot.slane %v463_v15, 2  ;;  %575 = vst [vmem:[#allocation1] ss:$4 sm:$0xff] %v455_v12  ;;  %v468_v19 = vsel %vm452_vm0, %v378_v4, %v430_v9  ;;  %v472_v20 = vsel %vm456_vm1, %v379_v7, %v431_v10  ;;  %v385_v33 = vld [vmem:[%s3099_s16 + $0x24] sm:$0xf] }
  0x25   : > { %580 = vst [vmem:[#allocation1 + $0x2] ss:$4 sm:$0xff] %v462_v14  ;;  %v471_v22 = vsel %vm452_vm0, %v379_v7, %v431_v10  ;;  %v474_v23 = vrot.slane %v472_v20, 2  ;;  %v434_v25 = vrot.slane %v382_v18, 2  ;;  %v477_v26 = vsel %vm452_vm0, %v380_v8, %v432_v11  ;;  %v386_v36 = vld [vmem:[%s3099_s16 + $0x28] sm:$0xf] }
  0x26   : > { %578 = vst [vmem:[#allocation1 + $0x1] ss:$4 sm:$0xff] %v459_v16  ;;  %v478_v27 = vsel %vm456_vm1, %v380_v8, %v432_v11  ;;  %v433_v28 = vrot.slane %v381_v21, 2  ;;  %v435_v29 = vrot.slane %v383_v24, 2  ;;  %v436_v40 = vrot.slane %v384_v32, 2  ;;  %s2788_s19 = smul.u32 3, %s3931_s12 }
  0x27   : > { %583 = vst [vmem:[#allocation1 + $0x3] ss:$4 sm:$0xff] %v465_v17  ;;  %v480_v30 = vrot.slane %v478_v27, 2  ;;  %v487_v31 = vsel %vm456_vm1, %v382_v18, %v434_v25  ;;  %v486_v38 = vsel %vm452_vm0, %v382_v18, %v434_v25  ;;  %v437_v41 = vrot.slane %v385_v33, 2  ;;  %v388_v45 = vld [vmem:[%s3099_s16 + $0x30] sm:$0xf] }
  0x28   : > { %585 = vst [vmem:[#allocation1 + $0x20] ss:$4 sm:$0xff] %v468_v19  ;;  %v483_v34 = vsel %vm452_vm0, %v381_v21, %v433_v28  ;;  %v493_v35 = vsel %vm456_vm1, %v383_v24, %v435_v29  ;;  %v489_v39 = vrot.slane %v487_v31, 2  ;;  %v492_v42 = vsel %vm452_vm0, %v383_v24, %v435_v29  ;;  %v387_v49 = vld [vmem:[%s3099_s16 + $0x2c] sm:$0x3]  ;;  %s355_s18 = sadd.s32 %s2788_s19, %s2787_s9  ;;  %s3388_s19 = scalar_lea.vmem [#allocation3], %s3084_s20 }
  0x29   : > { %587 = vst [vmem:[#allocation1 + $0x21] ss:$4 sm:$0xff] %v471_v22  ;;  %v495_v43 = vrot.slane %v493_v35, 2  ;;  %v438_v44 = vrot.slane %v386_v36, 2  ;;  %v498_v47 = vsel %vm452_vm0, %v384_v32, %v436_v40  ;;  %v501_v48 = vsel %vm452_vm0, %v385_v33, %v437_v41  ;;  %v389_v51 = vld [vmem:[%s3099_s16 + $0x34] sm:$0xf] }
  0x2a   : > { %590 = vst [vmem:[#allocation1 + $0x22] ss:$4 sm:$0xff] %v474_v23  ;;  %v502_v50 = vsel %vm456_vm1, %v385_v33, %v437_v41  ;;  %v440_v52 = vrot.slane %v388_v45, 2  ;;  %v439_v54 = vrot.slane %v387_v49, 2  ;;  %v441_v56 = vrot.slane %v389_v51, 2 }
  0x2b   : > { %592 = vst [vmem:[#allocation1 + $0x23] ss:$4 sm:$0xff] %v477_v26  ;;  %v508_v53 = vsel %vm456_vm1, %v386_v36, %v438_v44  ;;  %v504_v55 = vrot.slane %v502_v50, 2  ;;  %v507_v57 = vsel %vm452_vm0, %v386_v36, %v438_v44  ;;  %v391_v61 = vld [vmem:[%s3099_s16 + $0x3c] sm:$0xf] }
  0x2c   : > { %v510_v58 = vrot.slane %v508_v53, 2  ;;  %v517_v59 = vsel %vm456_vm1, %v388_v45, %v440_v52  ;;  %v513_v62 = vsel %vm452_vm0, %v387_v49, %v439_v54  ;;  %v523_v63 = vsel %vm456_vm1, %v389_v51, %v441_v56  ;;  %v390_v0 = vld [vmem:[%s3099_s16 + $0x38] sm:$0x3]  ;;  %v392_v3 = vld [vmem:[%s3099_s16 + $0x40] sm:$0xf] }
  0x2d   : > { %v516_v1 = vsel %vm452_vm0, %v388_v45, %v440_v52  ;;  %v519_v2 = vrot.slane %v517_v59, 2  ;;  %v443_v4 = vrot.slane %v391_v61, 2  ;;  %v522_v6 = vsel %vm452_vm0, %v389_v51, %v441_v56  ;;  %v394_v9 = vld [vmem:[%s3099_s16 + $0x48] sm:$0xf]  ;;  %v393_v12 = vld [vmem:[%s3099_s16 + $0x44] sm:$0x3] }
  0x2e   : > { %v593_v37 = vld.sshfl [vmem:[#allocation1] sm:$0xff pattern:$0x73625140]  ;;  %v525_v7 = vrot.slane %v523_v63, 2  ;;  %v442_v8 = vrot.slane %v390_v0, 2  ;;  %v444_v10 = vrot.slane %v392_v3, 2 }
  0x2f   : > { %2544 = vmatmul.msk.bf16.vlgmr.msra.gmra.mxu0 %vm735_vm2, %v593_v37  ;;  %596 = vst [vmem:[#allocation1] ss:$4 sm:$0xff] %v480_v30  ;;  %v532_v11 = vsel %vm456_vm1, %v391_v61, %v443_v4  ;;  %v446_v13 = vrot.slane %v394_v9, 2  ;;  %v531_v16 = vsel %vm452_vm0, %v391_v61, %v443_v4  ;;  %v445_v18 = vrot.slane %v393_v12, 2  ;;  %v395_v19 = vld [vmem:[%s3099_s16 + $0x4c] sm:$0xf] }
  0x30   : > { %597 = vst [vmem:[#allocation1 + $0x1] ss:$4 sm:$0xff] %v483_v34  ;;  %v528_v14 = vsel %vm452_vm0, %v390_v0, %v442_v8  ;;  %v538_v15 = vsel %vm456_vm1, %v392_v3, %v444_v10  ;;  %v534_v17 = vrot.slane %v532_v11, 2  ;;  %v537_v21 = vsel %vm452_vm0, %v392_v3, %v444_v10  ;;  %v396_v26 = vld [vmem:[%s3099_s16 + $0x50] sm:$0x3] }
  0x31   : > { %598 = vst [vmem:[#allocation1 + $0x2] ss:$4 sm:$0xff] %v486_v38  ;;  %v540_v22 = vrot.slane %v538_v15, 2  ;;  %v547_v23 = vsel %vm456_vm1, %v394_v9, %v446_v13  ;;  %v447_v24 = vrot.slane %v395_v19, 2  ;;  %v543_v25 = vsel %vm452_vm0, %v393_v12, %v445_v18  ;;  %v397_v30 = vld [vmem:[%s3099_s16 + $0x54] sm:$0xf] }
  0x32   : > { %v594_v46 = vld.sshfl [vmem:[#allocation1 + $0x20] sm:$0xff pattern:$0x73625140]  ;;  %600 = vst [vmem:[#allocation1 + $0x3] ss:$4 sm:$0xff] %v489_v39  ;;  %v546_v27 = vsel %vm452_vm0, %v394_v9, %v446_v13  ;;  %v549_v28 = vrot.slane %v547_v23, 2 }
  0x33   : > { %2545 = vmatmul.msk.bf16.vlgmr.msra.gmra.mxu1 %vm735_vm2, %v594_v46  ;;  %601 = vst [vmem:[#allocation1 + $0x20] ss:$4 sm:$0xff] %v492_v42  ;;  %v553_v31 = vsel %vm456_vm1, %v395_v19, %v447_v24  ;;  %v448_v32 = vrot.slane %v396_v26, 2  ;;  %v449_v33 = vrot.slane %v397_v30, 2  ;;  %v552_v34 = vsel %vm452_vm0, %v395_v19, %v447_v24  ;;  %v398_v39 = vld [vmem:[%s3099_s16 + $0x58] sm:$0xf] }
  0x34   : > { %603 = vst [vmem:[#allocation1 + $0x21] ss:$4 sm:$0xff] %v495_v43  ;;  %v555_v35 = vrot.slane %v553_v31, 2  ;;  %v399_v40 = vld [vmem:[%s3099_s16 + $0x5c] sm:$0x3]  ;;  %v450_v42 = vrot.slane %v398_v39, 2 }
  0x35   : > { %604 = vst [vmem:[#allocation1 + $0x22] ss:$4 sm:$0xff] %v498_v47  ;;  %v558_v37 = vsel %vm452_vm0, %v396_v26, %v448_v32  ;;  %v561_v38 = vsel %vm452_vm0, %v397_v30, %v449_v33  ;;  %v562_v41 = vsel %vm456_vm1, %v397_v30, %v449_v33  ;;  %v451_v43 = vrot.slane %v399_v40, 2  ;;  %v2865_v50 = vld [vmem:[%s3906_s3] ss:$0 sm:$0xff]  ;;  %s2543_s16 = sshll.u32 %s355_s18, 2 }
  0x36   : > { %605 = vst [vmem:[#allocation1 + $0x23] ss:$4 sm:$0xff] %v501_v48  ;;  %v564_v44 = vrot.slane %v562_v41, 2  ;;  %v567_v46 = vsel %vm452_vm0, %v398_v39, %v450_v42  ;;  %v568_v47 = vsel %vm456_vm1, %v398_v39, %v450_v42  ;;  %v574_v52 = vrot.slane %v2865_v50, 4  ;;  %s3282_s29 = scalar_lea.vmem %s3904_s1, %s2543_s16 }
  0x37   : > { %v570_v48 = vrot.slane %v568_v47, 2  ;;  %v573_v49 = vsel %vm452_vm0, %v399_v40, %v451_v43  ;;  %v363_v32 = vlaneseq }
  0x39   : > { %v606_v60 = vld.sshfl [vmem:[#allocation1] sm:$0xff pattern:$0x73625140] }
  0x3a   : > { %2546 = vmatmul.msk.bf16.vlgmr.msra.gmra.mxu2 %vm735_vm2, %v606_v60  ;;  %609 = vst [vmem:[#allocation1] ss:$4 sm:$0xff] %v504_v55 }
  0x3b   : > { %610 = vst [vmem:[#allocation1 + $0x1] ss:$4 sm:$0xff] %v507_v57 }
  0x3c   : > { %612 = vst [vmem:[#allocation1 + $0x2] ss:$4 sm:$0xff] %v510_v58 }
  0x3d   : > { %v607_v5 = vld.sshfl [vmem:[#allocation1 + $0x20] sm:$0xff pattern:$0x73625140]  ;;  %613 = vst [vmem:[#allocation1 + $0x3] ss:$4 sm:$0xff] %v513_v62 }
  0x3e   : > { %614 = vst [vmem:[#allocation1 + $0x20] ss:$4 sm:$0xff] %v516_v1 }
  0x3f   : > { %616 = vst [vmem:[#allocation1 + $0x21] ss:$4 sm:$0xff] %v519_v2 }
  0x40   : > { %617 = vst [vmem:[#allocation1 + $0x22] ss:$4 sm:$0xff] %v522_v6 }
  0x41   : > { %619 = vst [vmem:[#allocation1 + $0x23] ss:$4 sm:$0xff] %v525_v7 }
  0x44   : > { %v620_v20 = vld.sshfl [vmem:[#allocation1] sm:$0xff pattern:$0x73625140] }
  0x45   : > { %622 = vst [vmem:[#allocation1] ss:$4 sm:$0xff] %v528_v14 }
  0x46   : > { %623 = vst [vmem:[#allocation1 + $0x1] ss:$4 sm:$0xff] %v531_v16 }
  0x47   : > { %625 = vst [vmem:[#allocation1 + $0x2] ss:$4 sm:$0xff] %v534_v17 }
  0x48   : > { %626 = vst [vmem:[#allocation1 + $0x3] ss:$4 sm:$0xff] %v537_v21  ;;  %v621_v29 = vld.sshfl [vmem:[#allocation1 + $0x20] sm:$0xff pattern:$0x73625140] }
  0x49   : > { %628 = vst [vmem:[#allocation1 + $0x20] ss:$4 sm:$0xff] %v540_v22 }
  0x4a   : > { %2547 = vmatmul.msk.bf16.gmra.mxu2 %vm735_vm2, %v607_v5  ;;  %629 = vst [vmem:[#allocation1 + $0x21] ss:$4 sm:$0xff] %v543_v25 }
  0x4b   : > { %630 = vst [vmem:[#allocation1 + $0x22] ss:$4 sm:$0xff] %v546_v27 }
  0x4c   : > { %632 = vst [vmem:[#allocation1 + $0x23] ss:$4 sm:$0xff] %v549_v28 }
  0x4f   : > { %v633_v36 = vld.sshfl [vmem:[#allocation1] sm:$0xff pattern:$0x73625140] }
  0x50   : > { %2550 = vmatmul.msk.bf16.vlgmr.msra.gmra.mxu3 %vm735_vm2, %v633_v36  ;;  %635 = vst [vmem:[#allocation1] ss:$4 sm:$0xff] %v552_v34  ;;  %v3211_v36 = vshrl.u32 %v363_v32, 7 }
  0x51   : > { %637 = vst [vmem:[#allocation1 + $0x1] ss:$4 sm:$0xff] %v555_v35 }
  0x52   : > { %638 = vst [vmem:[#allocation1 + $0x2] ss:$4 sm:$0xff] %v558_v37  ;;  %v3215_v41 = vadd.s32 16, %v3211_v36  ;;  %vm367_vm6 = vcmp.ge.s32.totalorder %v3211_v36, 2 }
  0x53   : > { %v634_v45 = vld.sshfl [vmem:[#allocation1 + $0x20] sm:$0xff pattern:$0x73625140]  ;;  %639 = vst [vmem:[#allocation1 + $0x3] ss:$4 sm:$0xff] %v561_v38 }
  0x54   : > { %641 = vst [vmem:[#allocation1 + $0x20] ss:$4 sm:$0xff] %v564_v44  ;;  %vm372_vm4 = vcmp.lt.s32.totalorder %v3215_v41, 18 }
  0x55   : > { %642 = vst [vmem:[#allocation1 + $0x21] ss:$4 sm:$0xff] %v567_v46 }
  0x56   : > { %644 = vst [vmem:[#allocation1 + $0x22] ss:$4 sm:$0xff] %v570_v48 }
  0x57   : > { %645 = vst [vmem:[#allocation1 + $0x23] ss:$4 sm:$0xff] %v573_v49 }
  0x58   : > { %652 = vst [vmem:[#allocation1 + $0x10] ss:$2 sm:$0xff] %v2865_v50 }
  0x59   : > { %654 = vst [vmem:[#allocation1 + $0x11] ss:$2 sm:$0xff] %v574_v52 }
  0x5a   : > { %2548 = vmatmul.msk.bf16.gmra.mxu2 %vm735_vm2, %v620_v20  ;;  %v646_v51 = vld.sshfl [vmem:[#allocation1] sm:$0xff pattern:$0x73625140]  ;;  %660 = vst [vmem:[#allocation1 + $0x30] ss:$2 sm:$0xff] %v574_v52 }
  0x5b   : > { %648 = vst [vmem:[#allocation1] ss:$2 sm:$0xff] %v2865_v50 }
  0x5c   : > { %650 = vst [vmem:[#allocation1 + $0x1] ss:$2 sm:$0xff] %v574_v52 }
  0x5d   : > { %662 = vst [vmem:[#allocation1 + $0x31] ss:$2 sm:$0xff] %v2865_v50 }
  0x5e   : > { %v647_v53 = vld.sshfl [vmem:[#allocation1 + $0x20] sm:$0xff pattern:$0x73625140] }
  0x5f   : > { %656 = vst [vmem:[#allocation1 + $0x20] ss:$2 sm:$0xff] %v2865_v50 }
  0x60   : > { %2551 = vmatmul.msk.bf16.gmra.mxu3 %vm735_vm2, %v634_v45  ;;  %658 = vst [vmem:[#allocation1 + $0x21] ss:$2 sm:$0xff] %v2865_v50  ;;  %v664_v57 = vld.sshfl [vmem:[#allocation1 + $0x10] sm:$0xff pattern:$0x75316420] }
  0x61   : > { %669 = vst [vmem:[#allocation1 + $0x10] ss:$2 sm:$0xff] %v2865_v50 }
  0x62   : > { %670 = vst [vmem:[#allocation1 + $0x11] ss:$2 sm:$0xff] %v574_v52 }
  0x63   : > { %v663_v54 = vld.sshfl [vmem:[#allocation1] sm:$0xff pattern:$0x75316420] }
  0x64   : > { %667 = vst [vmem:[#allocation1] ss:$2 sm:$0xff] %v574_v52  ;;  %v666_v61 = vld.sshfl [vmem:[#allocation1 + $0x30] sm:$0xff pattern:$0x75316420] }
  0x65   : > { %668 = vst [vmem:[#allocation1 + $0x1] ss:$2 sm:$0xff] %v2865_v50 }
  0x66   : > { %673 = vst [vmem:[#allocation1 + $0x30] ss:$2 sm:$0xff] %v2865_v50 }
  0x67   : > { %v665_v59 = vld.sshfl [vmem:[#allocation1 + $0x20] sm:$0xff pattern:$0x75316420]  ;;  %674 = vst [vmem:[#allocation1 + $0x31] ss:$2 sm:$0xff] %v2865_v50 }
  0x68   : > { %671 = vst [vmem:[#allocation1 + $0x20] ss:$2 sm:$0xff] %v2865_v50 }
  0x69   : > { %672 = vst [vmem:[#allocation1 + $0x21] ss:$2 sm:$0xff] %v574_v52  ;;  %v3184_v60 = vld.sshfl [vmem:[#allocation1 + $0x10] sm:$0xff pattern:$0x75316420] }
  0x6a   : > { %2549 = vmatmul.msk.bf16.gmra.mxu2 %vm735_vm2, %v621_v29  ;;  %681 = vst [vmem:[#allocation1 + $0x10] ss:$2 sm:$0xff] %v574_v52 }
  0x6b   : > { %682 = vst [vmem:[#allocation1 + $0x11] ss:$2 sm:$0xff] %v2865_v50 }
  0x6c   : > { %v3177_v55 = vld.sshfl [vmem:[#allocation1] sm:$0xff pattern:$0x75316420] }
  0x6d   : > { %679 = vst [vmem:[#allocation1] ss:$2 sm:$0xff] %v574_v52 }
  0x6e   : > { %680 = vst [vmem:[#allocation1 + $0x1] ss:$2 sm:$0xff] %v2865_v50  ;;  %v3190_v0 = vld.sshfl [vmem:[#allocation1 + $0x30] sm:$0xff pattern:$0x75316420] }
  0x6f   : > { %685 = vst [vmem:[#allocation1 + $0x30] ss:$2 sm:$0xff] %v2865_v50 }
  0x70   : > { %2552 = vmatmul.msk.bf16.gmra.mxu3 %vm735_vm2, %v646_v51  ;;  %v3186_v62 = vld.sshfl [vmem:[#allocation1 + $0x20] sm:$0xff pattern:$0x75316420]  ;;  %686 = vst [vmem:[#allocation1 + $0x31] ss:$2 sm:$0xff] %v574_v52 }
  0x71   : > { %683 = vst [vmem:[#allocation1 + $0x20] ss:$2 sm:$0xff] %v2865_v50 }
  0x72   : > { %684 = vst [vmem:[#allocation1 + $0x21] ss:$2 sm:$0xff] %v574_v52  ;;  %v3188_v63 = vld.sshfl [vmem:[#allocation1 + $0x10] sm:$0xff pattern:$0x75316420] }
  0x73   : > { %693 = vst [vmem:[#allocation1 + $0x10] ss:$2 sm:$0xff] %v574_v52 }
  0x74   : > { %694 = vst [vmem:[#allocation1 + $0x11] ss:$2 sm:$0xff] %v2865_v50 }
  0x75   : > { %v3179_v56 = vld.sshfl [vmem:[#allocation1] sm:$0xff pattern:$0x75316420] }
  0x76   : > { %691 = vst [vmem:[#allocation1] ss:$2 sm:$0xff] %v2865_v50 }
  0x77   : > { %692 = vst [vmem:[#allocation1 + $0x1] ss:$2 sm:$0xff] %v2865_v50  ;;  %v3196_v3 = vld.sshfl [vmem:[#allocation1 + $0x30] sm:$0xff pattern:$0x75316420] }
  0x78   : > { %697 = vst [vmem:[#allocation1 + $0x30] ss:$2 sm:$0xff] %v2865_v50 }
  0x79   : > { %v3192_v1 = vld.sshfl [vmem:[#allocation1 + $0x20] sm:$0xff pattern:$0x75316420]  ;;  %698 = vst [vmem:[#allocation1 + $0x31] ss:$2 sm:$0xff] %v574_v52 }
  0x7a   : > { %695 = vst [vmem:[#allocation1 + $0x20] ss:$2 sm:$0xff] %v574_v52 }
  0x7b   : > { %696 = vst [vmem:[#allocation1 + $0x21] ss:$2 sm:$0xff] %v2865_v50  ;;  %v3194_v2 = vld.sshfl [vmem:[#allocation1 + $0x10] sm:$0xff pattern:$0x75316420] }
  0x7c   : > { %705 = vst [vmem:[#allocation1 + $0x10] ss:$2 sm:$0xff] %v2865_v50 }
  0x7d   : > { %706 = vst [vmem:[#allocation1 + $0x11] ss:$2 sm:$0xff] %v2865_v50 }
  0x7e   : > { %v3182_v58 = vld.sshfl [vmem:[#allocation1] sm:$0xff pattern:$0x75316420] }
  0x7f   : > { %703 = vst [vmem:[#allocation1] ss:$2 sm:$0xff] %v2865_v50 }
  0x80   : > { %2553 = vmatmul.msk.bf16.gmra.mxu3 %vm735_vm2, %v647_v53  ;;  %704 = vst [vmem:[#allocation1 + $0x1] ss:$2 sm:$0xff] %v574_v52  ;;  %v3200_v5 = vld.sshfl [vmem:[#allocation1 + $0x30] sm:$0xff pattern:$0x75316420] }
  0x81   : > { %709 = vst [vmem:[#allocation1 + $0x30] ss:$2 sm:$0xff] %v574_v52 }
  0x82   : > { %v3198_v4 = vld.sshfl [vmem:[#allocation1 + $0x20] sm:$0xff pattern:$0x75316420]  ;;  %710 = vst [vmem:[#allocation1 + $0x31] ss:$2 sm:$0xff] %v2865_v50 }
  0x83   : > { %707 = vst [vmem:[#allocation1 + $0x20] ss:$2 sm:$0xff] %v574_v52 }
  0x84   : > { %708 = vst [vmem:[#allocation1 + $0x21] ss:$2 sm:$0xff] %v2865_v50  ;;  %v3208_v21 = vld.sshfl [vmem:[#allocation1 + $0x10] sm:$0xff pattern:$0x75316420] }
  0x87   : > { %v3202_v8 = vld.sshfl [vmem:[#allocation1] sm:$0xff pattern:$0x75316420] }
  0x89   : > { %v3206_v16 = vld.sshfl [vmem:[#allocation1 + $0x30] sm:$0xff pattern:$0x75316420] }
  0x8b   : > { %v3204_v14 = vld.sshfl [vmem:[#allocation1 + $0x20] sm:$0xff pattern:$0x75316420] }
  0xac   : > { %v768_v6 = vpop.f32.mrf.mxu0 }
  0xad   : > { %v769_v7 = vadd.f32 %v768_v6, %v663_v54 }
  0xaf   : > { %v838_v9 = vrot.slane %v769_v7, 4  ;;  %v878_v10 = vmax.f32 %v769_v7, 0.0 }
  0xb0   : > { %v773_v11 = vpop.f32.mrf.mxu1 }
  0xb1   : > { %v879_v12 = vmax.f32 %v838_v9, 0.0  ;;  %964 = vst [vmem:[#allocation1] ss:$2 sm:$0xff] %v878_v10  ;;  %v774_v13 = vadd.f32 %v773_v11, %v665_v59 }
  0xb3   : > { %966 = vst [vmem:[#allocation1 + $0x1] ss:$2 sm:$0xff] %v879_v12  ;;  %v840_v15 = vrot.slane %v774_v13, 4  ;;  %v882_v17 = vmax.f32 %v774_v13, 0.0 }
  0xb4   : > { %v770_v18 = vpop.f32.mrf.mxu0 }
  0xb5   : > { %v883_v19 = vmax.f32 %v840_v15, 0.0  ;;  %v771_v20 = vadd.f32 %v770_v18, %v664_v57  ;;  %972 = vst [vmem:[#allocation1 + $0x20] ss:$2 sm:$0xff] %v882_v17 }
  0xb7   : > { %977 = vst [vmem:[#allocation1 + $0x30] ss:$2 sm:$0xff] %v883_v19  ;;  %v839_v22 = vrot.slane %v771_v20, 4  ;;  %v880_v23 = vmax.f32 %v771_v20, 0.0 }
  0xb8   : > { %v775_v24 = vpop.f32.mrf.mxu1 }
  0xb9   : > { %v881_v25 = vmax.f32 %v839_v22, 0.0  ;;  %968 = vst [vmem:[#allocation1 + $0x10] ss:$2 sm:$0xff] %v880_v23  ;;  %v776_v26 = vadd.f32 %v775_v24, %v666_v61 }
  0xba   : > { %v973_v29 = vld.sshfl [vmem:[#allocation1] sm:$0xff pattern:$0x75316420] }
  0xbb   : > { %970 = vst [vmem:[#allocation1 + $0x11] ss:$2 sm:$0xff] %v881_v25  ;;  %v841_v27 = vrot.slane %v776_v26, 4  ;;  %v884_v28 = vmax.f32 %v776_v26, 0.0  ;;  %v1059_v54 = vsel %vm367_vm6, %v973_v29, 0.0 }
  0xbc   : > { %v975_v43 = vld.sshfl [vmem:[#allocation1 + $0x20] sm:$0xff pattern:$0x75316420] }
  0xbd   : > { %v885_v30 = vmax.f32 %v841_v27, 0.0  ;;  %979 = vst [vmem:[#allocation1 + $0x31] ss:$2 sm:$0xff] %v884_v28  ;;  %v778_v31 = vpop.f32.mrf.mxu2  ;;  %v1061_v12 = vsel %vm372_vm4, %v975_v43, 0.0 }
  0xbe   : > { %v779_v33 = vadd.f32 %v778_v31, %v3177_v55  ;;  %v1085_v18 = vpack.c.bf16 %v1061_v12, %v1061_v12 }
  0xbf   : > { %981 = vst [vmem:[#allocation1] ss:$2 sm:$0xff] %v885_v30 }
  0xc0   : > { %v842_v34 = vrot.slane %v779_v33, 4  ;;  %v886_v35 = vmax.f32 %v779_v33, 0.0  ;;  %1111 = vst.msk [vmem:[#allocation2 + $0x8] sm:$0x3] %vm1110_vm5, %v1085_v18 }
  0xc2   : > { %v974_v37 = vld.sshfl [vmem:[#allocation1 + $0x10] sm:$0xff pattern:$0x75316420]  ;;  %v887_v38 = vmax.f32 %v842_v34, 0.0  ;;  %982 = vst [vmem:[#allocation1 + $0x1] ss:$2 sm:$0xff] %v886_v35 }
  0xc3   : > { %v1084_v39 = vpack.c.bf16 %v974_v37, %v974_v37 }
  0xc4   : > { %983 = vst [vmem:[#allocation1 + $0x10] ss:$2 sm:$0xff] %v887_v38  ;;  %v980_v55 = vld.sshfl [vmem:[#allocation1 + $0x30] sm:$0xff pattern:$0x75316420] }
  0xc5   : > { %v780_v40 = vpop.f32.mrf.mxu2  ;;  %1109 = vst.msk [vmem:[#allocation2 + $0x4] sm:$0xf] %vm1107_vm3, %v1084_v39  ;;  %v1062_v13 = vsel %vm367_vm6, %v980_v55, 0.0 }
  0xc6   : > { %v781_v42 = vadd.f32 %v780_v40, %v3184_v60  ;;  %v1083_v60 = vpack.c.bf16 %v1059_v54, %v1059_v54  ;;  %v1086_v19 = vpack.c.bf16 %v1062_v13, %v1062_v13 }
  0xc8   : > { %v843_v44 = vrot.slane %v781_v42, 4  ;;  %v888_v45 = vmax.f32 %v781_v42, 0.0  ;;  %1108 = vst.msk [vmem:[#allocation2] sm:$0xf] %vm1107_vm3, %v1083_v60 }
  0xc9   : > { %v984_v46 = vld.sshfl [vmem:[#allocation1] sm:$0xff pattern:$0x75316420]  ;;  %1112 = vst.msk [vmem:[#allocation2 + $0xc] sm:$0xf] %vm1107_vm3, %v1086_v19 }
  0xca   : > { %v1087_v47 = vpack.c.bf16 %v984_v46, %v984_v46  ;;  %v889_v48 = vmax.f32 %v843_v44, 0.0  ;;  %986 = vst [vmem:[#allocation1 + $0x20] ss:$2 sm:$0xff] %v888_v45 }
  0xcb   : > { %v985_v49 = vld.sshfl [vmem:[#allocation1 + $0x10] sm:$0xff pattern:$0x75316420] }
  0xcc   : > { %988 = vst [vmem:[#allocation1 + $0x21] ss:$2 sm:$0xff] %v889_v48  ;;  %v1064_v50 = vsel %vm372_vm4, %v985_v49, 0.0 }
  0xcd   : > { %v783_v51 = vpop.f32.mrf.mxu2  ;;  %1113 = vst.msk [vmem:[#allocation2 + $0x10] sm:$0xf] %vm1107_vm3, %v1087_v47  ;;  %v1088_v52 = vpack.c.bf16 %v1064_v50, %v1064_v50 }
  0xce   : > { %v784_v53 = vadd.f32 %v783_v51, %v3186_v62 }
  0xcf   : > { %1114 = vst.msk [vmem:[#allocation2 + $0x14] sm:$0x3] %vm1110_vm5, %v1088_v52 }
  0xd0   : > { %v844_v57 = vrot.slane %v784_v53, 4  ;;  %v890_v59 = vmax.f32 %v784_v53, 0.0 }
  0xd2   : > { %v891_v61 = vmax.f32 %v844_v57, 0.0  ;;  %989 = vst [vmem:[#allocation1 + $0x30] ss:$2 sm:$0xff] %v890_v59 }
  0xd3   : > { %v991_v6 = vld.sshfl [vmem:[#allocation1 + $0x20] sm:$0xff pattern:$0x75316420]  ;;  %v798_v7 = vpop.f32.mrf.mxu3 }
  0xd4   : > { %990 = vst [vmem:[#allocation1 + $0x31] ss:$2 sm:$0xff] %v891_v61  ;;  %v1065_v9 = vsel %vm367_vm6, %v991_v6, 0.0  ;;  %v799_v38 = vadd.f32 %v798_v7, %v3182_v58 }
  0xd5   : > { %v785_v62 = vpop.f32.mrf.mxu2  ;;  %v1089_v10 = vpack.c.bf16 %v1065_v9, %v1065_v9 }
  0xd6   : > { %v786_v11 = vadd.f32 %v785_v62, %v3190_v0  ;;  %v850_v45 = vrot.slane %v799_v38, 4 }
  0xd7   : > { %1115 = vst.msk [vmem:[#allocation2 + $0x18] sm:$0xf] %vm1107_vm3, %v1089_v10 }
  0xd8   : > { %v845_v15 = vrot.slane %v786_v11, 4  ;;  %v892_v17 = vmax.f32 %v786_v11, 0.0  ;;  %v903_v51 = vmax.f32 %v850_v45, 0.0 }
  0xda   : > { %v893_v20 = vmax.f32 %v845_v15, 0.0  ;;  %993 = vst [vmem:[#allocation1] ss:$2 sm:$0xff] %v892_v17 }
  0xdb   : > { %v992_v22 = vld.sshfl [vmem:[#allocation1 + $0x30] sm:$0xff pattern:$0x75316420]  ;;  %v800_v23 = vpop.f32.mrf.mxu3 }
  0xdc   : > { %v1090_v24 = vpack.c.bf16 %v992_v22, %v992_v22  ;;  %995 = vst [vmem:[#allocation1 + $0x10] ss:$2 sm:$0xff] %v893_v20  ;;  %v801_v47 = vadd.f32 %v800_v23, %v3194_v2 }
  0xdd   : > { %v788_v0 = vpop.f32.mrf.mxu2 }
  0xde   : > { %1116 = vst.msk [vmem:[#allocation2 + $0x1c] sm:$0xf] %vm1107_vm3, %v1090_v24  ;;  %v789_v25 = vadd.f32 %v788_v0, %v3179_v56  ;;  %v904_v55 = vmax.f32 %v801_v47, 0.0  ;;  %v851_v6 = vrot.slane %v801_v47, 4 }
  0xe0   : > { %v846_v26 = vrot.slane %v789_v25, 4  ;;  %v894_v27 = vmax.f32 %v789_v25, 0.0  ;;  %v905_v19 = vmax.f32 %v851_v6, 0.0 }
  0xe1   : > { %v994_v28 = vld.sshfl [vmem:[#allocation1] sm:$0xff pattern:$0x75316420] }
  0xe2   : > { %v895_v29 = vmax.f32 %v846_v26, 0.0  ;;  %996 = vst [vmem:[#allocation1 + $0x11] ss:$2 sm:$0xff] %v894_v27  ;;  %v1067_v30 = vsel %vm372_vm4, %v994_v28, 0.0 }
  0xe3   : > { %v803_v31 = vpop.f32.mrf.mxu3  ;;  %v1091_v32 = vpack.c.bf16 %v1067_v30, %v1067_v30 }
  0xe4   : > { %997 = vst [vmem:[#allocation1 + $0x20] ss:$2 sm:$0xff] %v895_v29  ;;  %v804_v12 = vadd.f32 %v803_v31, %v3198_v4 }
  0xe5   : > { %v790_v33 = vpop.f32.mrf.mxu2  ;;  %1117 = vst.msk [vmem:[#allocation2 + $0x20] sm:$0x3] %vm1110_vm5, %v1091_v32 }
  0xe6   : > { %v791_v34 = vadd.f32 %v790_v33, %v3188_v63  ;;  %v902_v63 = vmax.f32 %v799_v38, 0.0  ;;  %v906_v23 = vmax.f32 %v804_v12, 0.0  ;;  %v852_v0 = vrot.slane %v804_v12, 4 }
  0xe8   : > { %v847_v35 = vrot.slane %v791_v34, 4  ;;  %v896_v37 = vmax.f32 %v791_v34, 0.0  ;;  %v907_v27 = vmax.f32 %v852_v0, 0.0 }
  0xe9   : > { %v1000_v56 = vld.sshfl [vmem:[#allocation1 + $0x10] sm:$0xff pattern:$0x75316420] }
  0xea   : > { %v897_v39 = vmax.f32 %v847_v35, 0.0  ;;  %998 = vst [vmem:[#allocation1 + $0x21] ss:$2 sm:$0xff] %v896_v37  ;;  %v1068_v40 = vsel %vm367_vm6, %v1000_v56, 0.0  ;;  %v1133_v35 = vld [vmem:[%s3282_s29] sm:$0xf] }
  0xeb   : > { %v805_v42 = vpop.f32.mrf.mxu3  ;;  %v1092_v43 = vpack.c.bf16 %v1068_v40, %v1068_v40  ;;  %v1134_v40 = vld [vmem:[%s3282_s29 + $0x4] sm:$0xf] }
  0xec   : > { %999 = vst [vmem:[#allocation1 + $0x30] ss:$2 sm:$0xff] %v897_v39  ;;  %v806_v50 = vadd.f32 %v805_v42, %v3200_v5 }
  0xed   : > { %v793_v44 = vpop.f32.mrf.mxu2  ;;  %1118 = vst.msk [vmem:[#allocation2 + $0x24] sm:$0xf] %vm1107_vm3, %v1092_v43 }
  0xee   : > { %v794_v46 = vadd.f32 %v793_v44, %v3192_v1  ;;  %v853_v2 = vrot.slane %v806_v50, 4  ;;  %v908_v7 = vmax.f32 %v806_v50, 0.0 }
  0xf0   : > { %v848_v48 = vrot.slane %v794_v46, 4  ;;  %v898_v58 = vmax.f32 %v794_v46, 0.0  ;;  %v909_v10 = vmax.f32 %v853_v2, 0.0 }
  0xf1   : > { %v1001_v49 = vld.sshfl [vmem:[#allocation1 + $0x20] sm:$0xff pattern:$0x75316420] }
  0xf2   : > { %1007 = vst [vmem:[#allocation1 + $0x20] ss:$2 sm:$0xff] %v902_v63  ;;  %v1093_v52 = vpack.c.bf16 %v1001_v49, %v1001_v49  ;;  %v899_v54 = vmax.f32 %v848_v48, 0.0  ;;  %v1162_v49 = vrot.slane %v1134_v40, 2 }
  0xf3   : > { %v1002_v53 = vld.sshfl [vmem:[#allocation1 + $0x30] sm:$0xff pattern:$0x75316420]  ;;  %1003 = vst [vmem:[#allocation1] ss:$2 sm:$0xff] %v898_v58  ;;  %v808_v1 = vpop.f32.mrf.mxu3  ;;  %v1161_v58 = vrot.slane %v1133_v35, 2 }
  0xf4   : > { %1011 = vst [vmem:[#allocation1 + $0x30] ss:$2 sm:$0xff] %v903_v51  ;;  %v809_v57 = vadd.f32 %v808_v1, %v3202_v8  ;;  %v1070_v59 = vsel %vm372_vm4, %v1002_v53, 0.0  ;;  %v1136_v1 = vld [vmem:[%s3282_s29 + $0xc] sm:$0xf] }
  0xf5   : > { %1119 = vst.msk [vmem:[#allocation2 + $0x28] sm:$0xf] %vm1107_vm3, %v1093_v52  ;;  %v795_v5 = vpop.f32.mrf.mxu2  ;;  %v1094_v61 = vpack.c.bf16 %v1070_v59, %v1070_v59  ;;  %v1164_v6 = vrot.slane %v1136_v1, 2 }
  0xf6   : > { %1012 = vst [vmem:[#allocation1 + $0x31] ss:$2 sm:$0xff] %v904_v55  ;;  %v796_v60 = vadd.f32 %v795_v5, %v3196_v3  ;;  %v854_v11 = vrot.slane %v809_v57, 4  ;;  %v910_v13 = vmax.f32 %v809_v57, 0.0  ;;  %v1145_v3 = vld [vmem:[%s3905_s2] sm:$0x3]  ;;  %v1176_v57 = vsel %vm456_vm1, %v1133_v35, %v1161_v58 }
  0xf7   : > { %1004 = vst [vmem:[#allocation1 + $0x1] ss:$2 sm:$0xff] %v899_v54  ;;  %v1332_v18 = vsel %vm452_vm0, %v1145_v3, 0  ;;  %v1138_v3 = vld [vmem:[%s3282_s29 + $0x14] sm:$0x3] }
  0xf8   : > { %v849_v9 = vrot.slane %v796_v60, 4  ;;  %v900_v62 = vmax.f32 %v796_v60, 0.0  ;;  %1120 = vst.msk [vmem:[#allocation2 + $0x2c] sm:$0x3] %vm1110_vm5, %v1094_v61  ;;  %1341 = vmatpush.bf16.msrb.mxu0 %v1332_v18  ;;  %2785 = vmatpush.bf16.msrb.mxu1 %v1332_v18  ;;  %v911_v4 = vmax.f32 %v854_v11, 0.0 }
  0xf9   : > { %v1010_v8 = vld.sshfl [vmem:[#allocation1 + $0x20] sm:$0xff pattern:$0x75316420]  ;;  %v1135_v60 = vld [vmem:[%s3282_s29 + $0x8] sm:$0x3] }
  0xfa   : > { %1019 = vst [vmem:[#allocation1 + $0x20] ss:$2 sm:$0xff] %v908_v7  ;;  %v901_v15 = vmax.f32 %v849_v9, 0.0  ;;  %v1073_v20 = vsel %vm372_vm4, %v1010_v8, 0.0  ;;  %v1182_v7 = vsel %vm456_vm1, %v1134_v40, %v1162_v49  ;;  %v1137_v9 = vld [vmem:[%s3282_s29 + $0x10] sm:$0xf] }
  0xfb   : > { %1020 = vst [vmem:[#allocation1 + $0x21] ss:$2 sm:$0xff] %v909_v10  ;;  %v810_v17 = vpop.f32.mrf.mxu3  ;;  %v1097_v25 = vpack.c.bf16 %v1073_v20, %v1073_v20  ;;  %v1178_v8 = vrot.slane %v1176_v57, 2  ;;  %v1139_v10 = vld [vmem:[%s3282_s29 + $0x18] sm:$0xf]  ;;  %v1163_v11 = vrot.slane %v1135_v60, 2 }
  0xfc   : > { %1005 = vst [vmem:[#allocation1 + $0x10] ss:$2 sm:$0xff] %v900_v62  ;;  %v811_v26 = vadd.f32 %v810_v17, %v3208_v21  ;;  %v1175_v62 = vsel %vm452_vm0, %v1133_v35, %v1161_v58  ;;  %v1191_v17 = vsel %vm456_vm1, %v1136_v1, %v1164_v6  ;;  %v1141_v35 = vld [vmem:[%s3282_s29 + $0x20] sm:$0x3] }
  0xfd   : > { %v1013_v22 = vld.sshfl [vmem:[#allocation1 + $0x30] sm:$0xff pattern:$0x75316420]  ;;  %1006 = vst [vmem:[#allocation1 + $0x11] ss:$2 sm:$0xff] %v901_v15  ;;  %v1184_v15 = vrot.slane %v1182_v7, 2 }
  0xfe   : > { %v1008_v24 = vld.sshfl [vmem:[#allocation1] sm:$0xff pattern:$0x75316420]  ;;  %1021 = vst [vmem:[#allocation1 + $0x30] ss:$2 sm:$0xff] %v910_v13  ;;  %v912_v32 = vmax.f32 %v811_v26, 0.0  ;;  %v1181_v13 = vsel %vm452_vm0, %v1134_v40, %v1162_v49 }
  0xff   : > { %1014 = vst [vmem:[#allocation1] ss:$2 sm:$0xff] %v905_v19  ;;  %v855_v21 = vrot.slane %v811_v26, 4  ;;  %v1071_v43 = vsel %vm367_vm6, %v1008_v24, 0.0  ;;  %v1074_v44 = vsel %vm367_vm6, %v1013_v22, 0.0  ;;  %v1165_v19 = vrot.slane %v1137_v9, 2 }
 0x100   : > { %1015 = vst [vmem:[#allocation1 + $0x1] ss:$2 sm:$0xff] %v906_v23  ;;  %v1095_v63 = vpack.c.bf16 %v1071_v43, %v1071_v43  ;;  %v1098_v52 = vpack.c.bf16 %v1074_v44, %v1074_v44  ;;  %v1187_v22 = vsel %vm452_vm0, %v1135_v60, %v1163_v11  ;;  %v1140_v23 = vld [vmem:[%s3282_s29 + $0x1c] sm:$0xf]  ;;  %v1193_v26 = vrot.slane %v1191_v17, 2 }
 0x101   : > { %1022 = vst [vmem:[#allocation1 + $0x31] ss:$2 sm:$0xff] %v911_v4  ;;  %v913_v45 = vmax.f32 %v855_v21, 0.0  ;;  %v1167_v4 = vrot.slane %v1139_v10, 2  ;;  %v1169_v43 = vrot.slane %v1141_v35, 2 }
 0x102   : > { %1123 = vst.msk [vmem:[#allocation2 + $0x38] sm:$0x3] %vm1110_vm5, %v1097_v25  ;;  %v1023_v38 = vld.sshfl [vmem:[#allocation1 + $0x20] sm:$0xff pattern:$0x75316420]  ;;  %v1190_v25 = vsel %vm452_vm0, %v1136_v1, %v1164_v6 }
 0x103   : > { %v813_v28 = vpop.f32.mrf.mxu3  ;;  %v1077_v51 = vsel %vm367_vm6, %v1023_v38, 0.0  ;;  %1121 = vst.msk [vmem:[#allocation2 + $0x30] sm:$0xf] %vm1107_vm3, %v1095_v63  ;;  %v1206_v21 = vsel %vm456_vm1, %v1139_v10, %v1167_v4  ;;  %v1205_v38 = vsel %vm452_vm0, %v1139_v10, %v1167_v4 }
 0x104   : > { %v1009_v29 = vld.sshfl [vmem:[#allocation1 + $0x10] sm:$0xff pattern:$0x75316420]  ;;  %v814_v30 = vadd.f32 %v813_v28, %v3204_v14  ;;  %v1101_v59 = vpack.c.bf16 %v1077_v51, %v1077_v51  ;;  %1124 = vst.msk [vmem:[#allocation2 + $0x3c] sm:$0xf] %vm1107_vm3, %v1098_v52 }
 0x105   : > { %1016 = vst [vmem:[#allocation1 + $0x10] ss:$2 sm:$0xff] %v907_v27  ;;  %v1096_v31 = vpack.c.bf16 %v1009_v29, %v1009_v29  ;;  %v1197_v27 = vsel %vm456_vm1, %v1137_v9, %v1165_v19  ;;  %v1166_v29 = vrot.slane %v1138_v3, 2 }
 0x106   : > { %v856_v33 = vrot.slane %v814_v30, 4  ;;  %v914_v42 = vmax.f32 %v814_v30, 0.0  ;;  %1127 = vst.msk [vmem:[#allocation2 + $0x48] sm:$0xf] %vm1107_vm3, %v1101_v59  ;;  %v1196_v30 = vsel %vm452_vm0, %v1137_v9, %v1165_v19 }
 0x107   : > { %v1017_v34 = vld.sshfl [vmem:[#allocation1] sm:$0xff pattern:$0x75316420]  ;;  %1122 = vst.msk [vmem:[#allocation2 + $0x34] sm:$0xf] %vm1107_vm3, %v1096_v31 }
 0x108   : > { %v1099_v37 = vpack.c.bf16 %v1017_v34, %v1017_v34  ;;  %v1024_v56 = vld.sshfl [vmem:[#allocation1 + $0x30] sm:$0xff pattern:$0x75316420]  ;;  %1025 = vst [vmem:[#allocation1] ss:$2 sm:$0xff] %v912_v32  ;;  %v915_v14 = vmax.f32 %v856_v33, 0.0 }
 0x109   : > { %v1102_v39 = vpack.c.bf16 %v1024_v56, %v1024_v56  ;;  %v1168_v32 = vrot.slane %v1140_v23, 2  ;;  %v1199_v34 = vrot.slane %v1197_v27, 2  ;;  %v1142_v56 = vld [vmem:[%s3282_s29 + $0x24] sm:$0xf] }
 0x10a   : > { %1125 = vst.msk [vmem:[#allocation2 + $0x40] sm:$0xf] %vm1107_vm3, %v1099_v37  ;;  %v1202_v37 = vsel %vm452_vm0, %v1138_v3, %v1166_v29  ;;  %v1170_v44 = vrot.slane %v1142_v56, 2 }
 0x10b   : > { %1128 = vst.msk [vmem:[#allocation2 + $0x4c] sm:$0xf] %vm1107_vm3, %v1102_v39  ;;  %v815_v46 = vpop.f32.mrf.mxu3  ;;  %v1208_v39 = vrot.slane %v1206_v21, 2 }
 0x10c   : > { %v1018_v47 = vld.sshfl [vmem:[#allocation1 + $0x10] sm:$0xff pattern:$0x75316420]  ;;  %1029 = vst [vmem:[#allocation1 + $0x20] ss:$2 sm:$0xff] %v915_v14  ;;  %v816_v48 = vadd.f32 %v815_v46, %v3206_v16  ;;  %v1221_v58 = vsel %vm456_vm1, %v1142_v56, %v1170_v44  ;;  %v1220_v51 = vsel %vm452_vm0, %v1142_v56, %v1170_v44 }
 0x10d   : > { %1027 = vst [vmem:[#allocation1 + $0x10] ss:$2 sm:$0xff] %v913_v45  ;;  %v1076_v50 = vsel %vm372_vm4, %v1018_v47, 0.0  ;;  %v1143_v14 = vld [vmem:[%s3282_s29 + $0x28] sm:$0xf]  ;;  %v1211_v45 = vsel %vm452_vm0, %v1140_v23, %v1168_v32 }
 0x10e   : > { %1028 = vst [vmem:[#allocation1 + $0x11] ss:$2 sm:$0xff] %v914_v42  ;;  %v857_v53 = vrot.slane %v816_v48, 4  ;;  %v916_v54 = vmax.f32 %v816_v48, 0.0  ;;  %v1100_v2 = vpack.c.bf16 %v1076_v50, %v1076_v50  ;;  %v1212_v42 = vsel %vm456_vm1, %v1140_v23, %v1168_v32  ;;  %v2866_v47 = vld [vmem:[%s3906_s3] ss:$0 sm:$0xff] }
 0x10f   : > { %v1026_v55 = vld.sshfl [vmem:[#allocation1] sm:$0xff pattern:$0x75316420]  ;;  %v1214_v46 = vrot.slane %v1212_v42, 2  ;;  %v1171_v63 = vrot.slane %v1143_v14, 2  ;;  %v1217_v48 = vsel %vm452_vm0, %v1141_v35, %v1169_v43  ;;  %v1233_v1 = vrot.slane %v2866_v47, 4 }
 0x110   : > { %v917_v16 = vmax.f32 %v857_v53, 0.0  ;;  %1030 = vst [vmem:[#allocation1 + $0x21] ss:$2 sm:$0xff] %v916_v54  ;;  %v1079_v5 = vsel %vm372_vm4, %v1026_v55, 0.0  ;;  %v1144_v50 = vld [vmem:[%s3282_s29 + $0x2c] sm:$0x3] }
 0x111   : > { %v1103_v61 = vpack.c.bf16 %v1079_v5, %v1079_v5  ;;  %1126 = vst.msk [vmem:[#allocation2 + $0x44] sm:$0x3] %vm1110_vm5, %v1100_v2  ;;  %v1227_v52 = vsel %vm456_vm1, %v1143_v14, %v1171_v63  ;;  %v1223_v53 = vrot.slane %v1221_v58, 2  ;;  %v1172_v54 = vrot.slane %v1144_v50, 2 }
 0x112   : > { %1031 = vst [vmem:[#allocation1 + $0x30] ss:$2 sm:$0xff] %v917_v16  ;;  %v1226_v55 = vsel %vm452_vm0, %v1143_v14, %v1171_v63  ;;  %v1229_v2 = vrot.slane %v1227_v52, 2 }
 0x113   : > { %1129 = vst.msk [vmem:[#allocation2 + $0x50] sm:$0x3] %vm1110_vm5, %v1103_v61  ;;  %v1232_v57 = vsel %vm452_vm0, %v1144_v50, %v1172_v54 }
 0x115   : > { %v1032_v12 = vld.sshfl [vmem:[#allocation1 + $0x10] sm:$0xff pattern:$0x75316420] }
 0x116   : > { %1234 = vst [vmem:[#allocation1] ss:$4 sm:$0xff] %v1175_v62  ;;  %v1080_v24 = vsel %vm367_vm6, %v1032_v12, 0.0 }
 0x117   : > { %v1033_v18 = vld.sshfl [vmem:[#allocation1 + $0x20] sm:$0xff pattern:$0x75316420]  ;;  %1237 = vst [vmem:[#allocation1 + $0x1] ss:$4 sm:$0xff] %v1178_v8  ;;  %v1104_v31 = vpack.c.bf16 %v1080_v24, %v1080_v24 }
 0x118   : > { %v1105_v20 = vpack.c.bf16 %v1033_v18, %v1033_v18  ;;  %1239 = vst [vmem:[#allocation1 + $0x2] ss:$4 sm:$0xff] %v1181_v13 }
 0x119   : > { %v1034_v0 = vld.sshfl [vmem:[#allocation1 + $0x30] sm:$0xff pattern:$0x75316420]  ;;  %1242 = vst [vmem:[#allocation1 + $0x3] ss:$4 sm:$0xff] %v1184_v15 }
 0x11a   : > { %1131 = vst.msk [vmem:[#allocation2 + $0x58] sm:$0xf] %vm1107_vm3, %v1105_v20  ;;  %v1082_v28 = vsel %vm372_vm4, %v1034_v0, 0.0 }
 0x11b   : > { %1244 = vst [vmem:[#allocation1 + $0x20] ss:$4 sm:$0xff] %v1187_v22  ;;  %v1106_v33 = vpack.c.bf16 %v1082_v28, %v1082_v28 }
 0x11c   : > { %1246 = vst [vmem:[#allocation1 + $0x21] ss:$4 sm:$0xff] %v1190_v25 }
 0x11d   : > { %1249 = vst [vmem:[#allocation1 + $0x22] ss:$4 sm:$0xff] %v1193_v26 }
 0x11e   : > { %1251 = vst [vmem:[#allocation1 + $0x23] ss:$4 sm:$0xff] %v1196_v30 }
 0x11f   : > { %1130 = vst.msk [vmem:[#allocation2 + $0x54] sm:$0xf] %vm1107_vm3, %v1104_v31 }
 0x120   : > { %v1252_v40 = vld.sshfl [vmem:[#allocation1] sm:$0xff pattern:$0x73625140]  ;;  %1132 = vst.msk [vmem:[#allocation2 + $0x5c] sm:$0x3] %vm1110_vm5, %v1106_v33 }
 0x121   : > { %2554 = vmatmul.msk.bf16.vlgmr.msrb.gmra.mxu0 %vm735_vm2, %v1252_v40  ;;  %1255 = vst [vmem:[#allocation1] ss:$4 sm:$0xff] %v1199_v34 }
 0x122   : > { %1256 = vst [vmem:[#allocation1 + $0x1] ss:$4 sm:$0xff] %v1202_v37 }
 0x123   : > { %1257 = vst [vmem:[#allocation1 + $0x2] ss:$4 sm:$0xff] %v1205_v38 }
 0x124   : > { %1259 = vst [vmem:[#allocation1 + $0x3] ss:$4 sm:$0xff] %v1208_v39 }
 0x125   : > { %v1253_v49 = vld.sshfl [vmem:[#allocation1 + $0x20] sm:$0xff pattern:$0x73625140] }
 0x126   : > { %1260 = vst [vmem:[#allocation1 + $0x20] ss:$4 sm:$0xff] %v1211_v45 }
 0x127   : > { %1262 = vst [vmem:[#allocation1 + $0x21] ss:$4 sm:$0xff] %v1214_v46 }
 0x128   : > { %1263 = vst [vmem:[#allocation1 + $0x22] ss:$4 sm:$0xff] %v1217_v48 }
 0x129   : > { %1264 = vst [vmem:[#allocation1 + $0x23] ss:$4 sm:$0xff] %v1220_v51 }
 0x12a   : > { %1288 = vst [vmem:[#allocation1 + $0x31] ss:$2 sm:$0xff] %v2866_v47 }
 0x12b   : > { %v1265_v16 = vld.sshfl [vmem:[#allocation1] sm:$0xff pattern:$0x73625140]  ;;  %1286 = vst [vmem:[#allocation1 + $0x30] ss:$2 sm:$0xff] %v1233_v1 }
 0x12c   : > { %1268 = vst [vmem:[#allocation1] ss:$4 sm:$0xff] %v1223_v53 }
 0x12d   : > { %1269 = vst [vmem:[#allocation1 + $0x1] ss:$4 sm:$0xff] %v1226_v55 }
 0x12e   : > { %1271 = vst [vmem:[#allocation1 + $0x2] ss:$4 sm:$0xff] %v1229_v2 }
 0x12f   : > { %1272 = vst [vmem:[#allocation1 + $0x3] ss:$4 sm:$0xff] %v1232_v57 }
 0x130   : > { %v1266_v5 = vld.sshfl [vmem:[#allocation1 + $0x20] sm:$0xff pattern:$0x73625140]  ;;  %1278 = vst [vmem:[#allocation1 + $0x10] ss:$2 sm:$0xff] %v2866_v47 }
 0x131   : > { %1282 = vst [vmem:[#allocation1 + $0x20] ss:$2 sm:$0xff] %v2866_v47  ;;  %2557 = vmatmul.msk.bf16.vlgmr.msrb.gmra.mxu1 %vm735_vm2, %v1266_v5  ;;  %2555 = vmatmul.msk.bf16.gmra.mxu0 %vm735_vm2, %v1253_v49 }
 0x132   : > { %1284 = vst [vmem:[#allocation1 + $0x21] ss:$2 sm:$0xff] %v2866_v47  ;;  %v1292_v9 = vld.sshfl [vmem:[#allocation1 + $0x30] sm:$0xff pattern:$0x75316420] }
 0x133   : > { %1280 = vst [vmem:[#allocation1 + $0x11] ss:$2 sm:$0xff] %v1233_v1 }
 0x134   : > { %1299 = vst [vmem:[#allocation1 + $0x30] ss:$2 sm:$0xff] %v2866_v47 }
 0x135   : > { %1300 = vst [vmem:[#allocation1 + $0x31] ss:$2 sm:$0xff] %v2866_v47 }
 0x136   : > { %v1273_v59 = vld.sshfl [vmem:[#allocation1] sm:$0xff pattern:$0x73625140] }
 0x137   : > { %1274 = vst [vmem:[#allocation1] ss:$2 sm:$0xff] %v2866_v47 }
 0x138   : > { %1276 = vst [vmem:[#allocation1 + $0x1] ss:$2 sm:$0xff] %v1233_v1 }
 0x139   : > { %v1291_v7 = vld.sshfl [vmem:[#allocation1 + $0x20] sm:$0xff pattern:$0x75316420] }
 0x13a   : > { %v1290_v61 = vld.sshfl [vmem:[#allocation1 + $0x10] sm:$0xff pattern:$0x75316420]  ;;  %1297 = vst [vmem:[#allocation1 + $0x20] ss:$2 sm:$0xff] %v2866_v47 }
 0x13b   : > { %1295 = vst [vmem:[#allocation1 + $0x10] ss:$2 sm:$0xff] %v2866_v47 }
 0x13c   : > { %1296 = vst [vmem:[#allocation1 + $0x11] ss:$2 sm:$0xff] %v1233_v1  ;;  %v1304_v30 = vld.sshfl [vmem:[#allocation1 + $0x30] sm:$0xff pattern:$0x75316420] }
 0x13d   : > { %1298 = vst [vmem:[#allocation1 + $0x21] ss:$2 sm:$0xff] %v1233_v1 }
 0x13f   : > { %v1289_v60 = vld.sshfl [vmem:[#allocation1] sm:$0xff pattern:$0x75316420] }
 0x140   : > { %1293 = vst [vmem:[#allocation1] ss:$2 sm:$0xff] %v1233_v1 }
 0x141   : > { %2558 = vmatmul.msk.bf16.gmra.mxu1 %vm735_vm2, %v1273_v59  ;;  %2556 = vmatmul.msk.bf16.gmra.mxu0 %vm735_vm2, %v1265_v16  ;;  %1294 = vst [vmem:[#allocation1 + $0x1] ss:$2 sm:$0xff] %v2866_v47 }
 0x143   : > { %v3352_v62 = vld.sshfl [vmem:[#allocation1 + $0x10] sm:$0xff pattern:$0x75316420] }
 0x144   : > { %1307 = vst [vmem:[#allocation1 + $0x10] ss:$2 sm:$0xff] %v1233_v1  ;;  %v1303_v27 = vld.sshfl [vmem:[#allocation1 + $0x20] sm:$0xff pattern:$0x75316420] }
 0x145   : > { %1308 = vst [vmem:[#allocation1 + $0x11] ss:$2 sm:$0xff] %v2866_v47 }
 0x148   : > { %v3350_v6 = vld.sshfl [vmem:[#allocation1] sm:$0xff pattern:$0x75316420] }
 0x149   : > { %1305 = vst [vmem:[#allocation1] ss:$2 sm:$0xff] %v1233_v1 }
 0x14a   : > { %1306 = vst [vmem:[#allocation1 + $0x1] ss:$2 sm:$0xff] %v2866_v47 }
 0x14c   : > { %v1310_v18 = vld.sshfl [vmem:[#allocation1 + $0x10] sm:$0xff pattern:$0x75316420] }
 0x151   : > { %v3354_v11 = vld.sshfl [vmem:[#allocation1] sm:$0xff pattern:$0x75316420] }
 0x19e   : > { %v1343_v8 = vpop.f32.mrf.mxu0 }
 0x19f   : > { %v1344_v10 = vadd.f32 %v1343_v8, %v1289_v60 }
 0x1a1   : > { %v1378_v12 = vrot.slane %v1344_v10, 4  ;;  %v1398_v13 = vmax.f32 %v1344_v10, 0.0 }
 0x1a3   : > { %v1399_v15 = vmax.f32 %v1378_v12, 0.0  ;;  %1438 = vst [vmem:[#allocation1] ss:$2 sm:$0xff] %v1398_v13 }
 0x1a5   : > { %1440 = vst [vmem:[#allocation1 + $0x1] ss:$2 sm:$0xff] %v1399_v15 }
 0x1a6   : > { %v1345_v3 = vpop.f32.mrf.mxu0 }
 0x1a7   : > { %v1346_v17 = vadd.f32 %v1345_v3, %v1290_v61 }
 0x1a9   : > { %v1379_v19 = vrot.slane %v1346_v17, 4  ;;  %v1400_v20 = vmax.f32 %v1346_v17, 0.0 }
 0x1ab   : > { %v1401_v4 = vmax.f32 %v1379_v19, 0.0  ;;  %1442 = vst [vmem:[#allocation1 + $0x10] ss:$2 sm:$0xff] %v1400_v20 }
 0x1ac   : > { %v1447_v22 = vld.sshfl [vmem:[#allocation1] sm:$0xff pattern:$0x75316420] }
 0x1ad   : > { %1444 = vst [vmem:[#allocation1 + $0x11] ss:$2 sm:$0xff] %v1401_v4  ;;  %v1489_v23 = vsel %vm367_vm6, %v1447_v22, 0.0 }
 0x1ae   : > { %v1358_v24 = vpop.f32.mrf.mxu1  ;;  %v1348_v0 = vpop.f32.mrf.mxu0  ;;  %v1501_v25 = vpack.c.bf16 %v1489_v23, %v1489_v23 }
 0x1af   : > { %v1349_v26 = vadd.f32 %v1348_v0, %v1291_v7  ;;  %v1359_v14 = vadd.f32 %v1358_v24, %v1303_v27 }
 0x1b0   : > { %1514 = vst.msk [vmem:[#allocation2 + $0x60] sm:$0xf] %vm1107_vm3, %v1501_v25 }
 0x1b1   : > { %v1380_v28 = vrot.slane %v1349_v26, 4  ;;  %v1402_v29 = vmax.f32 %v1349_v26, 0.0  ;;  %v1384_v43 = vrot.slane %v1359_v14, 4  ;;  %v1410_v63 = vmax.f32 %v1359_v14, 0.0 }
 0x1b3   : > { %v1403_v31 = vmax.f32 %v1380_v28, 0.0  ;;  %1446 = vst [vmem:[#allocation1 + $0x20] ss:$2 sm:$0xff] %v1402_v29  ;;  %v1411_v58 = vmax.f32 %v1384_v43, 0.0 }
 0x1b4   : > { %v1448_v32 = vld.sshfl [vmem:[#allocation1 + $0x10] sm:$0xff pattern:$0x75316420] }
 0x1b5   : > { %1451 = vst [vmem:[#allocation1 + $0x30] ss:$2 sm:$0xff] %v1403_v31  ;;  %v1502_v33 = vpack.c.bf16 %v1448_v32, %v1448_v32 }
 0x1b6   : > { %v1360_v34 = vpop.f32.mrf.mxu1  ;;  %v1350_v21 = vpop.f32.mrf.mxu0 }
 0x1b7   : > { %v1351_v35 = vadd.f32 %v1350_v21, %v1292_v9  ;;  %1515 = vst.msk [vmem:[#allocation2 + $0x64] sm:$0xf] %vm1107_vm3, %v1502_v33  ;;  %v1361_v50 = vadd.f32 %v1360_v34, %v1304_v30 }
 0x1b9   : > { %v1381_v37 = vrot.slane %v1351_v35, 4  ;;  %v1404_v56 = vmax.f32 %v1351_v35, 0.0  ;;  %v1385_v55 = vrot.slane %v1361_v50, 4  ;;  %v1412_v60 = vmax.f32 %v1361_v50, 0.0 }
 0x1ba   : > { %v1449_v38 = vld.sshfl [vmem:[#allocation1 + $0x20] sm:$0xff pattern:$0x75316420] }
 0x1bb   : > { %v1405_v39 = vmax.f32 %v1381_v37, 0.0  ;;  %1453 = vst [vmem:[#allocation1 + $0x31] ss:$2 sm:$0xff] %v1404_v56  ;;  %v1491_v40 = vsel %vm372_vm4, %v1449_v38, 0.0  ;;  %v1413_v61 = vmax.f32 %v1385_v55, 0.0 }
 0x1bc   : > { %v1503_v42 = vpack.c.bf16 %v1491_v40, %v1491_v40 }
 0x1bd   : > { %1455 = vst [vmem:[#allocation1] ss:$2 sm:$0xff] %v1405_v39 }
 0x1be   : > { %v1363_v44 = vpop.f32.mrf.mxu1  ;;  %v1353_v45 = vpop.f32.mrf.mxu0  ;;  %1516 = vst.msk [vmem:[#allocation2 + $0x68] sm:$0x3] %vm1110_vm5, %v1503_v42 }
 0x1bf   : > { %v1354_v46 = vadd.f32 %v1353_v45, %v3350_v6  ;;  %v1364_v59 = vadd.f32 %v1363_v44, %v3354_v11 }
 0x1c1   : > { %v1382_v47 = vrot.slane %v1354_v46, 4  ;;  %v1406_v48 = vmax.f32 %v1354_v46, 0.0  ;;  %v1414_v13 = vmax.f32 %v1364_v59, 0.0  ;;  %v1386_v20 = vrot.slane %v1364_v59, 4 }
 0x1c2   : > { %v1454_v49 = vld.sshfl [vmem:[#allocation1 + $0x30] sm:$0xff pattern:$0x75316420] }
 0x1c3   : > { %1463 = vst [vmem:[#allocation1 + $0x30] ss:$2 sm:$0xff] %v1410_v63  ;;  %v1407_v51 = vmax.f32 %v1382_v47, 0.0  ;;  %v1492_v52 = vsel %vm367_vm6, %v1454_v49, 0.0  ;;  %v1415_v26 = vmax.f32 %v1386_v20, 0.0 }
 0x1c4   : > { %1464 = vst [vmem:[#allocation1 + $0x31] ss:$2 sm:$0xff] %v1411_v58  ;;  %v1504_v53 = vpack.c.bf16 %v1492_v52, %v1492_v52 }
 0x1c5   : > { %1456 = vst [vmem:[#allocation1 + $0x1] ss:$2 sm:$0xff] %v1406_v48 }
 0x1c6   : > { %v1365_v54 = vpop.f32.mrf.mxu1  ;;  %1457 = vst [vmem:[#allocation1 + $0x10] ss:$2 sm:$0xff] %v1407_v51  ;;  %v1355_v1 = vpop.f32.mrf.mxu0 }
 0x1c7   : > { %v1366_v2 = vadd.f32 %v1365_v54, %v1310_v18  ;;  %1517 = vst.msk [vmem:[#allocation2 + $0x6c] sm:$0xf] %vm1107_vm3, %v1504_v53  ;;  %v1356_v16 = vadd.f32 %v1355_v1, %v3352_v62 }
 0x1c9   : > { %v1387_v57 = vrot.slane %v1366_v2, 4  ;;  %v1408_v5 = vmax.f32 %v1356_v16, 0.0  ;;  %v1383_v8 = vrot.slane %v1356_v16, 4  ;;  %v1416_v28 = vmax.f32 %v1366_v2, 0.0 }
 0x1cb   : > { %v1466_v6 = vld.sshfl [vmem:[#allocation1 + $0x30] sm:$0xff pattern:$0x75316420]  ;;  %1460 = vst [vmem:[#allocation1 + $0x20] ss:$2 sm:$0xff] %v1408_v5  ;;  %v1417_v10 = vmax.f32 %v1387_v57, 0.0 }
 0x1cc   : > { %v1508_v7 = vpack.c.bf16 %v1466_v6, %v1466_v6  ;;  %v1458_v9 = vld.sshfl [vmem:[#allocation1] sm:$0xff pattern:$0x75316420]  ;;  %v1409_v11 = vmax.f32 %v1383_v8, 0.0 }
 0x1cd   : > { %v1459_v12 = vld.sshfl [vmem:[#allocation1 + $0x10] sm:$0xff pattern:$0x75316420]  ;;  %1467 = vst [vmem:[#allocation1] ss:$2 sm:$0xff] %v1412_v60  ;;  %v1505_v15 = vpack.c.bf16 %v1458_v9, %v1458_v9 }
 0x1ce   : > { %1521 = vst.msk [vmem:[#allocation2 + $0x7c] sm:$0xf] %vm1107_vm3, %v1508_v7  ;;  %v1494_v62 = vsel %vm372_vm4, %v1459_v12, 0.0 }
 0x1cf   : > { %1469 = vst [vmem:[#allocation1 + $0x10] ss:$2 sm:$0xff] %v1413_v61  ;;  %v1506_v3 = vpack.c.bf16 %v1494_v62, %v1494_v62 }
 0x1d0   : > { %1470 = vst [vmem:[#allocation1 + $0x11] ss:$2 sm:$0xff] %v1414_v13 }
 0x1d1   : > { %1473 = vst [vmem:[#allocation1 + $0x30] ss:$2 sm:$0xff] %v1417_v10 }
 0x1d2   : > { %1518 = vst.msk [vmem:[#allocation2 + $0x70] sm:$0xf] %vm1107_vm3, %v1505_v15 }
 0x1d3   : > { %1519 = vst.msk [vmem:[#allocation2 + $0x74] sm:$0x3] %vm1110_vm5, %v1506_v3 }
 0x1d4   : > { %v1468_v17 = vld.sshfl [vmem:[#allocation1] sm:$0xff pattern:$0x75316420]  ;;  %1462 = vst [vmem:[#allocation1 + $0x21] ss:$2 sm:$0xff] %v1409_v11 }
 0x1d5   : > { %v1497_v18 = vsel %vm372_vm4, %v1468_v17, 0.0 }
 0x1d6   : > { %v1509_v19 = vpack.c.bf16 %v1497_v18, %v1497_v18 }
 0x1d7   : > { %v1474_v4 = vld.sshfl [vmem:[#allocation1 + $0x10] sm:$0xff pattern:$0x75316420] }
 0x1d8   : > { %v1476_v22 = vld.sshfl [vmem:[#allocation1 + $0x30] sm:$0xff pattern:$0x75316420]  ;;  %v1498_v23 = vsel %vm367_vm6, %v1474_v4, 0.0  ;;  %1522 = vst.msk [vmem:[#allocation2 + $0x80] sm:$0x3] %vm1110_vm5, %v1509_v19 }
 0x1d9   : > { %v1500_v24 = vsel %vm372_vm4, %v1476_v22, 0.0  ;;  %v1510_v0 = vpack.c.bf16 %v1498_v23, %v1498_v23 }
 0x1da   : > { %v1512_v25 = vpack.c.bf16 %v1500_v24, %v1500_v24 }
 0x1db   : > { %1523 = vst.msk [vmem:[#allocation2 + $0x84] sm:$0xf] %vm1107_vm3, %v1510_v0  ;;  %v1465_v27 = vld.sshfl [vmem:[#allocation1 + $0x20] sm:$0xff pattern:$0x75316420] }
 0x1dc   : > { %1525 = vst.msk [vmem:[#allocation2 + $0x8c] sm:$0x3] %vm1110_vm5, %v1512_v25  ;;  %v1495_v29 = vsel %vm367_vm6, %v1465_v27, 0.0 }
 0x1dd   : > { %1471 = vst [vmem:[#allocation1 + $0x20] ss:$2 sm:$0xff] %v1415_v26  ;;  %v1507_v30 = vpack.c.bf16 %v1495_v29, %v1495_v29 }
 0x1de   : > { %1472 = vst [vmem:[#allocation1 + $0x21] ss:$2 sm:$0xff] %v1416_v28 }
 0x1df   : > { %1520 = vst.msk [vmem:[#allocation2 + $0x78] sm:$0xf] %vm1107_vm3, %v1507_v30 }
 0x1e4   : > { %1529 = sbr.rel (%p2559_p1) target bundleno = 496 (0x1f0), region = 48 }
 0x1e5   : > { %v1475_v41 = vld.sshfl [vmem:[#allocation1 + $0x20] sm:$0xff pattern:$0x75316420] }
 0x1e6   : > { %v1511_v31 = vpack.c.bf16 %v1475_v41, %v1475_v41 }
 0x1e8   : > { %1524 = vst.msk [vmem:[#allocation2 + $0x88] sm:$0xf] %vm1107_vm3, %v1511_v31 }
 0x1e9   : > { %v2964_v32 = vmov 0  }
 0x1ea   : > { %1530 = vst.msk [vmem:[#allocation2] sm:$0xf] %vm1107_vm3, %v2964_v32 }
 0x1eb   : > { %1531 = vst.msk [vmem:[#allocation2 + $0x4] sm:$0xf] %vm1107_vm3, %v2964_v32 }
 0x1ec   : > { %1532 = vst.msk [vmem:[#allocation2 + $0x8] sm:$0x3] %vm1110_vm5, %v2964_v32 }
 0x1ed   : > { %1533 = vst.msk [vmem:[#allocation2 + $0xc] sm:$0xf] %vm1107_vm3, %v2964_v32 }
 0x1ee   : > { %1534 = vst.msk [vmem:[#allocation2 + $0x10] sm:$0xf] %vm1107_vm3, %v2964_v32 }
 0x1ef   : > { %1535 = vst.msk [vmem:[#allocation2 + $0x14] sm:$0x3] %vm1110_vm5, %v2964_v32 }
 0x1f0 PF: > { %p2560_p2 = scmp.ne.s32.totalorder %s2946_s24, 1 }
 0x1f2   : > { %1539 = sbr.rel (%p2560_p2) target bundleno = 510 (0x1fe), region = 52 }
 0x1f7   : > { %v2965_v36 = vmov 0  }
 0x1f8   : > { %1541 = vst.msk [vmem:[#allocation2 + $0x78] sm:$0xf] %vm1107_vm3, %v2965_v36 }
 0x1f9   : > { %1542 = vst.msk [vmem:[#allocation2 + $0x7c] sm:$0xf] %vm1107_vm3, %v2965_v36 }
 0x1fa   : > { %1543 = vst.msk [vmem:[#allocation2 + $0x80] sm:$0x3] %vm1110_vm5, %v2965_v36 }
 0x1fb   : > { %1544 = vst.msk [vmem:[#allocation2 + $0x84] sm:$0xf] %vm1107_vm3, %v2965_v36 }
 0x1fc   : > { %1545 = vst.msk [vmem:[#allocation2 + $0x88] sm:$0xf] %vm1107_vm3, %v2965_v36 }
 0x1fd   : > { %1546 = vst.msk [vmem:[#allocation2 + $0x8c] sm:$0x3] %vm1110_vm5, %v2965_v36 }
 0x1fe PF: > { %v3404_v33 = vld [vmem:[#allocation2] sm:$0xff]  ;;  %v1549_v34 = vld [vmem:[#allocation2 + $0x8] sm:$0x3]  ;;  %v3406_v21 = vld [vmem:[#allocation2 + $0xc] sm:$0xff]  ;;  %vm1679_vm7 = vcmask 1046528   ;;  %s2966_s9 = smov 64  }
 0x1ff   : > { %v1655_v35 = vunpack.c.l.b16 %v1549_v34  ;;  %v1552_v37 = vld [vmem:[#allocation2 + $0x14] sm:$0x3]  ;;  %v3408_v56 = vld [vmem:[#allocation2 + $0x18] sm:$0xff]  ;;  %v1555_v14 = vld [vmem:[#allocation2 + $0x20] sm:$0x3]  ;;  %v1680_v44 = vrot.slane %v3404_v33, 1 }
 0x200   : > { %v1656_v38 = vunpack.c.l.b16 %v1552_v37  ;;  %v1657_v39 = vunpack.c.l.b16 %v1555_v14  ;;  %v3410_v40 = vld [vmem:[#allocation2 + $0x24] sm:$0xff]  ;;  %v1558_v42 = vld [vmem:[#allocation2 + $0x2c] sm:$0x3]  ;;  %v2770_v63 = vld [vmem:[%s3907_s4 + $0x74] sm:$0xf0]  ;;  %v1686_v49 = vrot.slane %v3408_v56, 1 }
 0x201   : > { %v3412_v43 = vpack.c.b16 %v1655_v35, %v1655_v35  ;;  %v1658_v45 = vunpack.c.l.b16 %v1558_v42  ;;  %v2667_v46 = vld [vmem:[%s3907_s4 + $0x70] sm:$0xf]  ;;  %v3421_v47 = vld [vmem:[#allocation2 + $0x30] sm:$0xff]  ;;  %v2769_v51 = vld [vmem:[%s3907_s4 + $0x74] sm:$0xf]  ;;  %v1683_v54 = vrot.slane %v3406_v21, 1 }
 0x202   : > { %v3423_v48 = vpack.c.b16 %v1656_v38, %v1656_v38  ;;  %v3425_v58 = vpack.c.b16 %v1657_v39, %v1657_v39  ;;  %v2668_v50 = vor.u32 %v2770_v63, %v2667_v46  ;;  %v2669_v52 = vld [vmem:[%s3907_s4 + $0x78] sm:$0xf0]  ;;  %v1561_v55 = vld [vmem:[#allocation2 + $0x38] sm:$0x3]  ;;  %v1689_v5 = vrot.slane %v3410_v40, 1  ;;  %v3480_v0 = vld [vmem:[#allocation2 + $0x48] sm:$0xff] }
 0x203   : > { %v1681_v53 = vrot.slane %v3412_v43, 1  ;;  %v2672_v1 = vor.u32 %v2769_v51, %v2669_v52  ;;  %v2659_v2 = vld [vmem:[%s3907_s4 + $0x60] sm:$0xf]  ;;  %v3440_v57 = vpack.c.b16 %v1658_v45, %v1658_v45  ;;  %v1659_v59 = vunpack.c.l.b16 %v1561_v55  ;;  %v2768_v60 = vld [vmem:[%s3907_s4 + $0x64] sm:$0xf0]  ;;  %s2732_s13 = sshll.u32 %s2950_s25, 5 }
 0x204   : > { %v1687_v16 = vrot.slane %v3425_v58, 1  ;;  %2006 = vmatpush.bf16.msrb.mxu2 %v2668_v50  ;;  %v2767_v61 = vld [vmem:[%s3907_s4 + $0x64] sm:$0xf]  ;;  %v1684_v7 = vrot.slane %v3423_v48, 1  ;;  %v1692_v9 = vrot.slane %v3421_v47, 1  ;;  %v2660_v8 = vor.u32 %v2768_v60, %v2659_v2  ;;  %s3916_s16 = sand.u32 1, %s2938_s22  }
 0x205   : > { %v1682_v6 = vsel %vm1679_vm7, %v1680_v44, %v1681_v53  ;;  %2136 = vmatpush.bf16.msra.mxu1 %v2672_v1  ;;  %v2661_v10 = vld [vmem:[%s3907_s4 + $0x68] sm:$0xf0]  ;;  %v2651_v12 = vld [vmem:[%s3907_s4 + $0x50] sm:$0xf]  ;;  %v3460_v62 = vpack.c.b16 %v1659_v59, %v1659_v59  ;;  %v2766_v3 = vld [vmem:[%s3907_s4 + $0x54] sm:$0xf0] }
 0x206   : > { %1716 = vrot.lane.b32.xlu0 %v1682_v6, %s2966_s9  ;;  %v1688_v13 = vsel %vm1679_vm7, %v1686_v49, %v1687_v16  ;;  %v2664_v15 = vor.u32 %v2767_v61, %v2661_v10  ;;  %v2699_v11 = vld [vmem:[%s3907_s4 + $0xb0] sm:$0xf]  ;;  %v2778_v17 = vld [vmem:[%s3907_s4 + $0xb4] sm:$0xf0]  ;;  %v2765_v19 = vld [vmem:[%s3907_s4 + $0x54] sm:$0xf]  ;;  %v2652_v24 = vor.u32 %v2766_v3, %v2651_v12  ;;  %v1685_v37 = vsel %vm1679_vm7, %v1683_v54, %v1684_v7 }
 0x207   : > { %1720 = vrot.lane.b32.xlu1 %v1688_v13, %s2966_s9  ;;  %v2700_v18 = vor.u32 %v2778_v17, %v2699_v11  ;;  %v2653_v20 = vld [vmem:[%s3907_s4 + $0x58] sm:$0xf0]  ;;  %v1567_v4 = vld [vmem:[#allocation2 + $0x50] sm:$0x3]  ;;  %v1690_v22 = vrot.slane %v3440_v57, 1  ;;  %v1693_v23 = vrot.slane %v3460_v62, 1 }
 0x208   : > { %2007 = vmatpush.bf16.msrb.mxu2 %v2660_v8  ;;  %v1661_v25 = vunpack.c.l.b16 %v1567_v4  ;;  %v2643_v26 = vld [vmem:[%s3907_s4 + $0x40] sm:$0xf]  ;;  %v2656_v27 = vor.u32 %v2765_v19, %v2653_v20  ;;  %v2764_v28 = vld [vmem:[%s3907_s4 + $0x44] sm:$0xf0]  ;;  %v2763_v36 = vld [vmem:[%s3907_s4 + $0x44] sm:$0xf] }
 0x209   : > { %2137 = vmatpush.bf16.msra.mxu1 %v2664_v15  ;;  %2075 = vmatpush.bf16.msrb.mxu3 %v2700_v18  ;;  %v2691_v29 = vld [vmem:[%s3907_s4 + $0xa0] sm:$0xf]  ;;  %v2776_v30 = vld [vmem:[%s3907_s4 + $0xa4] sm:$0xf0]  ;;  %v1694_v41 = vsel %vm1679_vm7, %v1692_v9, %v1693_v23  ;;  %v2645_v34 = vld [vmem:[%s3907_s4 + $0x48] sm:$0xf0]  ;;  %v1691_v39 = vsel %vm1679_vm7, %v1689_v5, %v1690_v22  ;;  %v2644_v44 = vor.u32 %v2764_v28, %v2643_v26 }
 0x20a   : > { %v3495_v31 = vpack.c.b16 %v1661_v25, %v1661_v25  ;;  %v2692_v32 = vor.u32 %v2776_v30, %v2691_v29  ;;  %v3503_v35 = vld [vmem:[#allocation2 + $0x3c] sm:$0xff]  ;;  %1724 = vrot.lane.b32.xlu2 %v1694_v41, %s2966_s9  ;;  %v2683_v14 = vld [vmem:[%s3907_s4 + $0x90] sm:$0xf]  ;;  %v2774_v38 = vld [vmem:[%s3907_s4 + $0x94] sm:$0xf0]  ;;  %v1698_v42 = vrot.slane %v3480_v0, 1  ;;  %v2648_v63 = vor.u32 %v2763_v36, %v2645_v34 }
 0x20b   : > { %v2635_v45 = vld [vmem:[%s3907_s4 + $0x30] sm:$0xf]  ;;  %v2777_v46 = vld [vmem:[%s3907_s4 + $0xb4] sm:$0xf]  ;;  %v2762_v49 = vld [vmem:[%s3907_s4 + $0x34] sm:$0xf0]  ;;  %v2684_v50 = vor.u32 %v2774_v38, %v2683_v14 }
 0x20c   : > { %2008 = vmatpush.bf16.msrb.mxu2 %v2652_v24  ;;  %v2701_v51 = vld [vmem:[%s3907_s4 + $0xb8] sm:$0xf0]  ;;  %v1564_v52 = vld [vmem:[#allocation2 + $0x44] sm:$0x3]  ;;  %v1699_v53 = vrot.slane %v3495_v31, 1  ;;  %v1695_v16 = vrot.slane %v3503_v35, 1  ;;  %v2636_v61 = vor.u32 %v2762_v49, %v2635_v45 }
 0x20d   : > { %2138 = vmatpush.bf16.msra.mxu1 %v2656_v27  ;;  %2076 = vmatpush.bf16.msrb.mxu3 %v2692_v32  ;;  %v2761_v54 = vld [vmem:[%s3907_s4 + $0x34] sm:$0xf]  ;;  %v2637_v1 = vld [vmem:[%s3907_s4 + $0x38] sm:$0xf0]  ;;  %v2704_v55 = vor.u32 %v2777_v46, %v2701_v51  ;;  %v1660_v2 = vunpack.c.l.b16 %v1564_v52  ;;  %v2675_v5 = vld [vmem:[%s3907_s4 + $0x80] sm:$0xf] }
 0x20e   : > { %1718 = vrot.lane.b32.xlu0 %v1685_v37, %s2966_s9  ;;  %v2772_v59 = vld [vmem:[%s3907_s4 + $0x84] sm:$0xf0]  ;;  %v2775_v60 = vld [vmem:[%s3907_s4 + $0xa4] sm:$0xf]  ;;  %v2627_v7 = vld [vmem:[%s3907_s4 + $0x20] sm:$0xf]  ;;  %v2640_v10 = vor.u32 %v2761_v54, %v2637_v1  ;;  %v1700_v22 = vsel %vm1679_vm7, %v1698_v42, %v1699_v53 }
 0x20f   : > { %1722 = vrot.lane.b32.xlu1 %v1691_v39, %s2966_s9  ;;  %2201 = vmatpush.bf16.msra.mxu0 %v2704_v55  ;;  %v3546_v6 = vpack.c.b16 %v1660_v2, %v1660_v2  ;;  %v2760_v9 = vld [vmem:[%s3907_s4 + $0x24] sm:$0xf0]  ;;  %v2693_v8 = vld [vmem:[%s3907_s4 + $0xa8] sm:$0xf0]  ;;  %v2759_v12 = vld [vmem:[%s3907_s4 + $0x24] sm:$0xf]  ;;  %v2676_v18 = vor.u32 %v2772_v59, %v2675_v5 }
 0x210   : > { %2009 = vmatpush.bf16.msrb.mxu2 %v2644_v44  ;;  %v2629_v13 = vld [vmem:[%s3907_s4 + $0x28] sm:$0xf0]  ;;  %v2696_v15 = vor.u32 %v2775_v60, %v2693_v8  ;;  %v1741_v3 = vrot.slane %v3404_v33, 2  ;;  %v1742_v11 = vrot.slane %v3412_v43, 2  ;;  %v2773_v19 = vld [vmem:[%s3907_s4 + $0x94] sm:$0xf]  ;;  %v2628_v24 = vor.u32 %v2760_v9, %v2627_v7 }
 0x211   : > { %2139 = vmatpush.bf16.msra.mxu1 %v2648_v63  ;;  %2077 = vmatpush.bf16.msrb.mxu3 %v2684_v50  ;;  %v1696_v17 = vrot.slane %v3546_v6, 1  ;;  %v2685_v20 = vld [vmem:[%s3907_s4 + $0x98] sm:$0xf0]  ;;  %vm1740_vm8 = vcmask 1045504   ;;  %v1570_v23 = vld [vmem:[#allocation2 + $0x5c] sm:$0x3]  ;;  %v2632_v29 = vor.u32 %v2759_v12, %v2629_v13 }
 0x212   : > { %v3572_v4 = vld [vmem:[#allocation2 + $0x54] sm:$0xff]  ;;  %v2619_v25 = vld [vmem:[%s3907_s4 + $0x10] sm:$0xf]  ;;  %v2758_v26 = vld [vmem:[%s3907_s4 + $0x14] sm:$0xf0]  ;;  %v2688_v27 = vor.u32 %v2773_v19, %v2685_v20  ;;  %v1662_v28 = vunpack.c.l.b16 %v1570_v23  ;;  %v1743_v32 = vsel %vm1740_vm8, %v1741_v3, %v1742_v11  ;;  %vm1777_vm9 = vcmask 523264  }
 0x213   : > { %v1697_v43 = vsel %vm1679_vm7, %v1695_v16, %v1696_v17  ;;  %2202 = vmatpush.bf16.msra.mxu0 %v2696_v15  ;;  %v2771_v30 = vld [vmem:[%s3907_s4 + $0x84] sm:$0xf]  ;;  %v2677_v41 = vld [vmem:[%s3907_s4 + $0x88] sm:$0xf0]  ;;  %v2757_v36 = vld [vmem:[%s3907_s4 + $0x14] sm:$0xf]  ;;  %v2620_v38 = vor.u32 %v2758_v26, %v2619_v25 }
 0x214   : > { %2010 = vmatpush.bf16.msrb.mxu2 %v2636_v61  ;;  %1726 = vrot.lane.b32.xlu2 %v1697_v43, %s2966_s9  ;;  %v2621_v34 = vld [vmem:[%s3907_s4 + $0x18] sm:$0xf0]  ;;  %v3597_v37 = vpack.c.b16 %v1662_v28, %v1662_v28  ;;  %v1701_v14 = vrot.slane %v3572_v4, 1  ;;  %v2680_v42 = vor.u32 %v2771_v30, %v2677_v41  ;;  %v2611_v45 = vld [vmem:[%s3907_s4] sm:$0xf]  ;;  %v1744_v53 = vrot.slane %v3406_v21, 2 }
 0x215   : > { %2140 = vmatpush.bf16.msra.mxu1 %v2640_v10  ;;  %2078 = vmatpush.bf16.msrb.mxu3 %v2676_v18  ;;  %v2624_v44 = vor.u32 %v2757_v36, %v2621_v34  ;;  %v2756_v46 = vld [vmem:[%s3907_s4 + $0x4] sm:$0xf0]  ;;  %v2755_v49 = vld [vmem:[%s3907_s4 + $0x4] sm:$0xf]  ;;  %v2613_v50 = vld [vmem:[%s3907_s4 + $0x8] sm:$0xf0] }
 0x216   : > { %1728 = vrot.lane.b32.xlu0 %v1700_v22, %s2966_s9  ;;  %v1702_v39 = vrot.slane %v3597_v37, 1  ;;  %v2612_v51 = vor.u32 %v2756_v46, %v2611_v45  ;;  %v2616_v52 = vor.u32 %v2755_v49, %v2613_v50  ;;  %v1745_v54 = vrot.slane %v3423_v48, 2  ;;  %v3624_v16 = vld [vmem:[#allocation2 + $0x6c] sm:$0xff]  ;;  %v1576_v5 = vld [vmem:[#allocation2 + $0x74] sm:$0x3]  ;;  %v3637_v13 = vld [vmem:[#allocation2 + $0x60] sm:$0xff] }
 0x217   : > { %2203 = vmatpush.bf16.msra.mxu0 %v2688_v27  ;;  %v1747_v55 = vrot.slane %v3408_v56, 2  ;;  %v1748_v2 = vrot.slane %v3425_v58, 2  ;;  %v1664_v59 = vunpack.c.l.b16 %v1576_v5  ;;  %v1707_v48 = vrot.slane %v3624_v16, 1  ;;  %v1573_v58 = vld [vmem:[#allocation2 + $0x68] sm:$0x3]  ;;  %s2407_s30 = scalar_lea.sflag [#allocation4], %s3916_s16 }
 0x218   : > { %2011 = vmatpush.bf16.msrb.mxu2 %v2628_v24  ;;  %2705 = vmatmul.msk.bf16.vlgmr.msrb.gmra.mxu3 %vm1777_vm9, %v1743_v32  ;;  %v1703_v63 = vsel %vm1679_vm7, %v1701_v14, %v1702_v39  ;;  %v1746_v1 = vsel %vm1740_vm8, %v1744_v53, %v1745_v54  ;;  %v1663_v8 = vunpack.c.l.b16 %v1573_v58  ;;  %v1750_v3 = vrot.slane %v3410_v40, 2  ;;  %v3675_v14 = vld [vmem:[#allocation2 + $0x78] sm:$0xff]  ;;  %v3702_v58 = vld [vmem:[#allocation2 + $0x84] sm:$0xff] }
 0x219   : > { %2141 = vmatpush.bf16.msra.mxu1 %v2632_v29  ;;  %1730 = vrot.lane.b32.xlu1 %v1703_v63, %s2966_s9  ;;  %v1749_v60 = vsel %vm1740_vm8, %v1747_v55, %v1748_v2  ;;  %v3628_v61 = vpack.c.b16 %v1664_v59, %v1664_v59  ;;  %v1751_v11 = vrot.slane %v3440_v57, 2  ;;  %v1704_v17 = vrot.slane %v3637_v13, 1 }
 0x21a   : > { %v3639_v15 = vpack.c.b16 %v1663_v8, %v1663_v8  ;;  %v1753_v57 = vrot.slane %v3421_v47, 2  ;;  %v1754_v23 = vrot.slane %v3460_v62, 2  ;;  %v1757_v26 = vrot.slane %v3546_v6, 2 }
 0x21b   : > { %2204 = vmatpush.bf16.msra.mxu0 %v2680_v42  ;;  %v1708_v7 = vrot.slane %v3628_v61, 1  ;;  %v1752_v19 = vsel %vm1740_vm8, %v1750_v3, %v1751_v11  ;;  %v1760_v41 = vrot.slane %v3495_v31, 2  ;;  %v1763_v34 = vrot.slane %v3597_v37, 2 }
 0x21c   : > { %2012 = vmatpush.bf16.msrb.mxu2 %v2620_v38  ;;  %v1705_v18 = vrot.slane %v3639_v15, 1  ;;  %v1755_v43 = vsel %vm1740_vm8, %v1753_v57, %v1754_v23  ;;  %v1579_v38 = vld [vmem:[#allocation2 + $0x80] sm:$0x3]  ;;  %v1765_v63 = vrot.slane %v3637_v13, 2  ;;  %v1766_v49 = vrot.slane %v3639_v15, 2 }
 0x21d   : > { %2142 = vmatpush.bf16.msra.mxu1 %v2624_v44  ;;  %v1709_v9 = vsel %vm1679_vm7, %v1707_v48, %v1708_v7  ;;  %v1665_v31 = vunpack.c.l.b16 %v1579_v38  ;;  %v1710_v44 = vrot.slane %v3675_v14, 1  ;;  %v1768_v54 = vrot.slane %v3624_v16, 2 }
 0x21e   : > { %2717 = vmatmul.msk.bf16.vlgmr.msra.gmra.mxu0 %vm1777_vm9, %v1743_v32  ;;  %1734 = vrot.lane.b32.xlu0 %v1709_v9, %s2966_s9  ;;  %v1706_v20 = vsel %vm1679_vm7, %v1704_v17, %v1705_v18  ;;  %v1767_v50 = vsel %vm1740_vm8, %v1765_v63, %v1766_v49  ;;  %v1713_v8 = vrot.slane %v3702_v58, 1  ;;  %v1771_v63 = vrot.slane %v3675_v14, 2 }
 0x21f   : > { %1732 = vrot.lane.b32.xlu2 %v1706_v20, %s2966_s9  ;;  %v3679_v42 = vpack.c.b16 %v1665_v31, %v1665_v31 }
 0x220   : > { %2013 = vmatpush.bf16.msrb.mxu2 %v2612_v51 }
 0x221   : > { %2143 = vmatpush.bf16.msra.mxu1 %v2616_v52  ;;  %v1772_v49 = vrot.slane %v3679_v42, 2 }
 0x228   : > { %2706 = vmatmul.msk.bf16.gmra.mxu3 %vm1777_vm9, %v1746_v1 }
 0x22e   : > { %2718 = vmatmul.msk.bf16.gmra.mxu0 %vm1777_vm9, %v1746_v1  ;;  %v1769_v1 = vrot.slane %v3628_v61, 2 }
 0x230   : > { %v1770_v2 = vsel %vm1740_vm8, %v1768_v54, %v1769_v1 }
 0x238   : > { %2707 = vmatmul.msk.bf16.gmra.mxu3 %vm1777_vm9, %v1749_v60 }
 0x23e   : > { %2719 = vmatmul.msk.bf16.gmra.mxu0 %vm1777_vm9, %v1749_v60  ;;  %v1582_v60 = vld [vmem:[#allocation2 + $0x8c] sm:$0x3] }
 0x23f   : > { %v1666_v48 = vunpack.c.l.b16 %v1582_v60 }
 0x241   : > { %v3704_v61 = vpack.c.b16 %v1666_v48, %v1666_v48 }
 0x248   : > { %2708 = vmatmul.msk.bf16.gmra.mxu3 %vm1777_vm9, %v1752_v19 }
 0x24e   : > { %2720 = vmatmul.msk.bf16.gmra.mxu0 %vm1777_vm9, %v1752_v19 }
 0x258   : > { %2709 = vmatmul.msk.bf16.gmra.mxu3 %vm1777_vm9, %v1755_v43 }
 0x25e   : > { %2721 = vmatmul.msk.bf16.gmra.mxu0 %vm1777_vm9, %v1755_v43 }
 0x264   : > { %v1725_v32 = vpop.permute.xlu2 %1724 }
 0x265   : > { %v1796_v36 = vsel %vm1777_vm9, %v3421_v47, %v1725_v32  ;;  %v1711_v47 = vrot.slane %v3679_v42, 1 }
 0x267   : > { %v1712_v45 = vsel %vm1679_vm7, %v1710_v44, %v1711_v47 }
 0x268   : > { %1736 = vrot.lane.b32.xlu1 %v1712_v45, %s2966_s9 }
 0x26e   : > { %v1727_v37 = vpop.permute.xlu2 %1726 }
 0x26f   : > { %v1800_v46 = vsel %vm1777_vm9, %v3503_v35, %v1727_v37 }
 0x278   : > { %v1717_v10 = vpop.permute.xlu0 %1716 }
 0x279   : > { %v1780_v12 = vsel %vm1777_vm9, %v3404_v33, %v1717_v10  ;;  %v1721_v24 = vpop.permute.xlu1 %1720  ;;  %v1714_v10 = vrot.slane %v3704_v61, 1 }
 0x27a   : > { %2014 = vmatmul.bf16.vlgmr.msrb.gmra.mxu2 %v1780_v12  ;;  %2144 = vmatmul.bf16.vlgmr.msra.gmra.mxu1 %v1780_v12  ;;  %v1788_v25 = vsel %vm1777_vm9, %v3408_v56, %v1721_v24  ;;  %v1759_v56 = vrot.slane %v3480_v0, 2 }
 0x27b   : > { %v1715_v12 = vsel %vm1679_vm7, %v1713_v8, %v1714_v10 }
 0x27c   : > { %v1761_v6 = vsel %vm1740_vm8, %v1759_v56, %v1760_v41  ;;  %1738 = vrot.lane.b32.xlu2 %v1715_v12, %s2966_s9 }
 0x280   : > { %v1719_v33 = vpop.permute.xlu0 %1718 }
 0x281   : > { %v1784_v22 = vsel %vm1777_vm9, %v3406_v21, %v1719_v33  ;;  %v1756_v21 = vrot.slane %v3503_v35, 2  ;;  %v1723_v62 = vpop.permute.xlu1 %1722 }
 0x282   : > { %v1792_v30 = vsel %vm1777_vm9, %v3410_v40, %v1723_v62  ;;  %v1762_v40 = vrot.slane %v3572_v4, 2 }
 0x283   : > { %v1758_v27 = vsel %vm1740_vm8, %v1756_v21, %v1757_v26 }
 0x284   : > { %2710 = vmatmul.msk.bf16.gmra.mxu3 %vm1777_vm9, %v1758_v27  ;;  %2722 = vmatmul.msk.bf16.gmra.mxu0 %vm1777_vm9, %v1758_v27  ;;  %v1764_v39 = vsel %vm1740_vm8, %v1762_v40, %v1763_v34 }
 0x288   : > { %v1729_v51 = vpop.permute.xlu0 %1728 }
 0x289   : > { %v1804_v52 = vsel %vm1777_vm9, %v3480_v0, %v1729_v51 }
 0x28a   : > { %2019 = vmatmul.bf16.gmra.mxu2 %v1784_v22  ;;  %2147 = vmatmul.bf16.gmra.mxu1 %v1784_v22 }
 0x28b   : > { %v1731_v59 = vpop.permute.xlu1 %1730 }
 0x28c   : > { %v1808_v0 = vsel %vm1777_vm9, %v3572_v4, %v1731_v59  ;;  %v1733_v4 = vpop.permute.xlu2 %1732 }
 0x28d   : > { %v1812_v17 = vsel %vm1777_vm9, %v3637_v13, %v1733_v4 }
 0x290   : > { %v1735_v23 = vpop.permute.xlu0 %1734 }
 0x291   : > { %v1816_v21 = vsel %vm1777_vm9, %v3624_v16, %v1735_v23 }
 0x294   : > { %2711 = vmatmul.msk.bf16.gmra.mxu3 %vm1777_vm9, %v1761_v6  ;;  %2723 = vmatmul.msk.bf16.gmra.mxu0 %vm1777_vm9, %v1761_v6 }
 0x29a   : > { %2024 = vmatmul.bf16.gmra.mxu2 %v1788_v25  ;;  %2150 = vmatmul.bf16.gmra.mxu1 %v1788_v25 }
 0x29b   : > { %v2206_v28 = vpop.f32.mrf.mxu0  ;;  %v2080_v53 = vpop.f32.mrf.mxu3 }
 0x2a3   : > { %v2207_v29 = vpop.f32.mrf.mxu0  ;;  %v2082_v55 = vpop.f32.mrf.mxu3 }
 0x2a4   : > { %2712 = vmatmul.msk.bf16.gmra.mxu3 %vm1777_vm9, %v1764_v39  ;;  %2724 = vmatmul.msk.bf16.gmra.mxu0 %vm1777_vm9, %v1764_v39 }
 0x2aa   : > { %2029 = vmatmul.bf16.gmra.mxu2 %v1792_v30  ;;  %2153 = vmatmul.bf16.gmra.mxu1 %v1792_v30 }
 0x2ab   : > { %v2209_v35 = vpop.f32.mrf.mxu0  ;;  %v2085_v9 = vpop.f32.mrf.mxu3 }
 0x2b3   : > { %v2210_v5 = vpop.f32.mrf.mxu0  ;;  %v2087_v3 = vpop.f32.mrf.mxu3 }
 0x2b4   : > { %2713 = vmatmul.msk.bf16.gmra.mxu3 %vm1777_vm9, %v1767_v50  ;;  %2725 = vmatmul.msk.bf16.gmra.mxu0 %vm1777_vm9, %v1767_v50 }
 0x2ba   : > { %2034 = vmatmul.bf16.gmra.mxu2 %v1796_v36  ;;  %2156 = vmatmul.bf16.gmra.mxu1 %v1796_v36 }
 0x2bb   : > { %v2212_v7 = vpop.f32.mrf.mxu0  ;;  %v2090_v22 = vpop.f32.mrf.mxu3 }
 0x2c3   : > { %v2213_v15 = vpop.f32.mrf.mxu0  ;;  %v2092_v26 = vpop.f32.mrf.mxu3 }
 0x2c4   : > { %2714 = vmatmul.msk.bf16.gmra.mxu3 %vm1777_vm9, %v1770_v2  ;;  %2726 = vmatmul.msk.bf16.gmra.mxu0 %vm1777_vm9, %v1770_v2 }
 0x2ca   : > { %2039 = vmatmul.bf16.gmra.mxu2 %v1800_v46  ;;  %2161 = vmatmul.bf16.gmra.mxu1 %v1800_v46 }
 0x2cb   : > { %v2215_v18 = vpop.f32.mrf.mxu0  ;;  %v2095_v62 = vpop.f32.mrf.mxu3 }
 0x2d3   : > { %v2216_v57 = vpop.f32.mrf.mxu0  ;;  %v2097_v6 = vpop.f32.mrf.mxu3 }
 0x2d6   : > { %v1739_v2 = vpop.permute.xlu2 %1738 }
 0x2d7   : > { %v1824_v5 = vsel %vm1777_vm9, %v3702_v58, %v1739_v2 }
 0x2da   : > { %2044 = vmatmul.bf16.gmra.mxu2 %v1804_v52  ;;  %2166 = vmatmul.bf16.gmra.mxu1 %v1804_v52  ;;  %v1737_v46 = vpop.permute.xlu1 %1736  ;;  %v1773_v52 = vsel %vm1740_vm8, %v1771_v63, %v1772_v49 }
 0x2db   : > { %v2100_v38 = vpop.f32.mrf.mxu3  ;;  %v1820_v51 = vsel %vm1777_vm9, %v3675_v14, %v1737_v46  ;;  %2727 = vmatmul.msk.bf16.gmra.mxu0 %vm1777_vm9, %v1773_v52  ;;  %2715 = vmatmul.msk.bf16.gmra.mxu3 %vm1777_vm9, %v1773_v52  ;;  %v1774_v14 = vrot.slane %v3702_v58, 2  ;;  %v2218_v8 = vpop.f32.mrf.mxu0 }
 0x2e3   : > { %v2102_v47 = vpop.f32.mrf.mxu3 }
 0x2ea   : > { %2049 = vmatmul.bf16.gmra.mxu2 %v1808_v0  ;;  %2171 = vmatmul.bf16.gmra.mxu1 %v1808_v0 }
 0x2f7   : > { %v2145_v11 = vpop.f32.mrf.mxu1 }
 0x2f8   : > { %v2220_v11 = vpop.f32.mrf.mxu0 }
 0x2fa   : > { %2054 = vmatmul.bf16.gmra.mxu2 %v1812_v17  ;;  %2176 = vmatmul.bf16.gmra.mxu1 %v1812_v17 }
 0x2fd   : > { %v2015_v19 = vpop.f32.mrf.mxu2 }
 0x2fe   : > { %v3712_v20 = vadd.f32 %v2080_v53, %v2015_v19 }
 0x2ff   : > { %v2146_v33 = vpop.f32.mrf.mxu1 }
 0x301   : > { %v2223_v57 = vpop.f32.mrf.mxu0 }
 0x305   : > { %v2017_v43 = vpop.f32.mrf.mxu2 }
 0x306   : > { %v3714_v24 = vadd.f32 %v2082_v55, %v2017_v43  ;;  %v1775_v55 = vrot.slane %v3704_v61, 2 }
 0x307   : > { %v2148_v25 = vpop.f32.mrf.mxu1  ;;  %v2105_v50 = vpop.f32.mrf.mxu3 }
 0x308   : > { %v1776_v59 = vsel %vm1740_vm8, %v1774_v14, %v1775_v55 }
 0x309   : > { %2728 = vmatmul.msk.bf16.gmra.mxu0 %vm1777_vm9, %v1776_v59  ;;  %2716 = vmatmul.msk.bf16.gmra.mxu3 %vm1777_vm9, %v1776_v59 }
 0x30a   : > { %2059 = vmatmul.bf16.gmra.mxu2 %v1816_v21  ;;  %2181 = vmatmul.bf16.gmra.mxu1 %v1816_v21 }
 0x30d   : > { %v2020_v13 = vpop.f32.mrf.mxu2 }
 0x30e   : > { %v3718_v27 = vadd.f32 %v2085_v9, %v2020_v13 }
 0x30f   : > { %v2149_v28 = vpop.f32.mrf.mxu1  ;;  %v2107_v42 = vpop.f32.mrf.mxu3 }
 0x315   : > { %v2022_v29 = vpop.f32.mrf.mxu2 }
 0x316   : > { %v3720_v30 = vadd.f32 %v2087_v3, %v2022_v29 }
 0x317   : > { %v2151_v56 = vpop.f32.mrf.mxu1  ;;  %v2110_v48 = vpop.f32.mrf.mxu3 }
 0x31a   : > { %2186 = vmatmul.bf16.gmra.mxu1 %v1820_v51  ;;  %2064 = vmatmul.bf16.gmra.mxu2 %v1820_v51 }
 0x31d   : > { %v2025_v41 = vpop.f32.mrf.mxu2 }
 0x31e   : > { %v3722_v32 = vadd.f32 %v2090_v22, %v2025_v41 }
 0x31f   : > { %v2152_v36 = vpop.f32.mrf.mxu1  ;;  %v2112_v58 = vpop.f32.mrf.mxu3 }
 0x320   : > { %2274 = vrot.lane.b32.xlu0 %v3722_v32, %s2966_s9 }
 0x325   : > { %v2027_v16 = vpop.f32.mrf.mxu2 }
 0x326   : > { %v3726_v40 = vadd.f32 %v2092_v26, %v2027_v16  ;;  %v2225_v26 = vpop.f32.mrf.mxu0 }
 0x327   : > { %v2154_v34 = vpop.f32.mrf.mxu1  ;;  %v2115_v15 = vpop.f32.mrf.mxu3 }
 0x328   : > { %2276 = vrot.lane.b32.xlu1 %v3726_v40, %s2966_s9 }
 0x32a   : > { %2191 = vmatmul.bf16.gmra.mxu1 %v1824_v5  ;;  %2067 = vmatmul.bf16.gmra.mxu2 %v1824_v5 }
 0x32d   : > { %v2030_v31 = vpop.f32.mrf.mxu2 }
 0x32e   : > { %v3730_v39 = vadd.f32 %v2095_v62, %v2030_v31  ;;  %v2228_v56 = vpop.f32.mrf.mxu0 }
 0x32f   : > { %v2155_v44 = vpop.f32.mrf.mxu1  ;;  %v2117_v19 = vpop.f32.mrf.mxu3 }
 0x330   : > { %2278 = vrot.lane.b32.xlu2 %v3730_v39, %s2966_s9 }
 0x335   : > { %v2032_v45 = vpop.f32.mrf.mxu2 }
 0x336   : > { %v3734_v37 = vadd.f32 %v2097_v6, %v2032_v45  ;;  %v2230_v46 = vpop.f32.mrf.mxu0 }
 0x337   : > { %v2157_v61 = vpop.f32.mrf.mxu1  ;;  %v2120_v25 = vpop.f32.mrf.mxu3 }
 0x338   : > { %2280 = vrot.lane.b32.xlu0 %v3734_v37, %s2966_s9  ;;  %v2219_v52 = vadd.f32 %v2218_v8, %v2157_v61 }
 0x33d   : > { %v2035_v53 = vpop.f32.mrf.mxu2 }
 0x33e   : > { %v3744_v35 = vadd.f32 %v2100_v38, %v2035_v53  ;;  %v3789_v38 = vld [vmem:[%s3908_s5] ss:$0 sm:$0xff]  ;;  %v2233_v5 = vpop.f32.mrf.mxu0 }
 0x33f   : > { %v2159_v4 = vpop.f32.mrf.mxu1  ;;  %v2122_v62 = vpop.f32.mrf.mxu3 }
 0x340   : > { %2282 = vrot.lane.b32.xlu1 %v3744_v35, %s2966_s9 }
 0x345   : > { %v2037_v54 = vpop.f32.mrf.mxu2 }
 0x346   : > { %v3749_v1 = vadd.f32 %v2102_v47, %v2037_v54 }
 0x347   : > { %v2162_v33 = vpop.f32.mrf.mxu1  ;;  %v2125_v34 = vpop.f32.mrf.mxu3 }
 0x348   : > { %2284 = vrot.lane.b32.xlu2 %v3749_v1, %s2966_s9  ;;  %v2224_v16 = vadd.f32 %v2223_v57, %v2162_v33 }
 0x34d   : > { %v2040_v0 = vpop.f32.mrf.mxu2 }
 0x34e   : > { %v3759_v60 = vadd.f32 %v2105_v50, %v2040_v0 }
 0x34f   : > { %v2164_v21 = vpop.f32.mrf.mxu1  ;;  %v2127_v54 = vpop.f32.mrf.mxu3 }
 0x350   : > { %2286 = vrot.lane.b32.xlu0 %v3759_v60, %s2966_s9  ;;  %v2226_v57 = vadd.f32 %v2225_v26, %v2164_v21 }
 0x355   : > { %v2042_v7 = vpop.f32.mrf.mxu2 }
 0x356   : > { %v3764_v9 = vadd.f32 %v2107_v42, %v2042_v7 }
 0x357   : > { %v2167_v29 = vpop.f32.mrf.mxu1 }
 0x358   : > { %2288 = vrot.lane.b32.xlu1 %v3764_v9, %s2966_s9 }
 0x35d   : > { %v2045_v10 = vpop.f32.mrf.mxu2 }
 0x35e   : > { %v3768_v12 = vadd.f32 %v2110_v48, %v2045_v10  ;;  %v2221_v48 = vadd.f32 %v2220_v11, %v2159_v4  ;;  %v2235_v10 = vpop.f32.mrf.mxu0 }
 0x35f   : > { %v2169_v44 = vpop.f32.mrf.mxu1 }
 0x360   : > { %2290 = vrot.lane.b32.xlu2 %v3768_v12, %s2966_s9 }
 0x365   : > { %v2047_v3 = vpop.f32.mrf.mxu2 }
 0x366   : > { %v3772_v17 = vadd.f32 %v2112_v58, %v2047_v3  ;;  %v2231_v3 = vadd.f32 %v2230_v46, %v2169_v44 }
 0x367   : > { %v2172_v14 = vpop.f32.mrf.mxu1 }
 0x368   : > { %2292 = vrot.lane.b32.xlu0 %v3772_v17, %s2966_s9 }
 0x36d   : > { %v2050_v18 = vpop.f32.mrf.mxu2 }
 0x36e   : > { %v3776_v22 = vadd.f32 %v2115_v15, %v2050_v18 }
 0x36f   : > { %v2174_v61 = vpop.f32.mrf.mxu1 }
 0x370   : > { %2294 = vrot.lane.b32.xlu1 %v3776_v22, %s2966_s9 }
 0x375   : > { %v2052_v23 = vpop.f32.mrf.mxu2 }
 0x376   : > { %v3780_v43 = vadd.f32 %v2117_v19, %v2052_v23 }
 0x377   : > { %v2177_v33 = vpop.f32.mrf.mxu1 }
 0x378   : > { %2296 = vrot.lane.b32.xlu2 %v3780_v43, %s2966_s9 }
 0x37d   : > { %v2055_v13 = vpop.f32.mrf.mxu2 }
 0x37e   : > { %v2121_v28 = vadd.f32 %v2120_v25, %v2055_v13  ;;  %v2238_v25 = vpop.f32.mrf.mxu0 }
 0x380   : > { %2298 = vrot.lane.b32.xlu0 %v2121_v28, %s2966_s9 }
 0x385   : > { %v2057_v41 = vpop.f32.mrf.mxu2 }
 0x386   : > { %v2123_v6 = vadd.f32 %v2122_v62, %v2057_v41 }
 0x388   : > { %2300 = vrot.lane.b32.xlu1 %v2123_v6, %s2966_s9  ;;  %v2229_v6 = vadd.f32 %v2228_v56, %v2167_v29 }
 0x38a   : > { %v2279_v36 = vpop.permute.xlu2 %2278 }
 0x38b   : > { %v2324_v31 = vadd.f32 %v2279_v36, %v3718_v27  ;;  %v2179_v36 = vpop.f32.mrf.mxu1 }
 0x38d   : > { %v2340_v47 = vadd.f32 %v2324_v31, %v2224_v16  ;;  %v2060_v45 = vpop.f32.mrf.mxu2  ;;  %v2239_v31 = vadd.f32 %v2238_v25, %v2177_v33 }
 0x38e   : > { %v2126_v63 = vadd.f32 %v2125_v34, %v2060_v45  ;;  %v2240_v34 = vpop.f32.mrf.mxu0 }
 0x38f   : > { %v2360_v49 = vadd.f32 %v3789_v38, %v2340_v47 }
 0x390   : > { %2302 = vrot.lane.b32.xlu2 %v2126_v63, %s2966_s9  ;;  %v2130_v63 = vpop.f32.mrf.mxu3 }
 0x391   : > { %v2376_v50 = vmax.f32 %v2360_v49, 0.0 }
 0x392   : > { %v2275_v51 = vpop.permute.xlu0 %2274 }
 0x393   : > { %2392 = vst.msk [vmem:[%s3388_s19 + $0x10] sm:$0xff] %vm1777_vm9, %v2376_v50  ;;  %v2322_v53 = vadd.f32 %v2275_v51, %v3712_v20  ;;  %v2182_v45 = vpop.f32.mrf.mxu1  ;;  %v2234_v50 = vadd.f32 %v2233_v5, %v2172_v14 }
 0x395   : > { %v2338_v42 = vadd.f32 %v2322_v53, %v2219_v52  ;;  %v2062_v27 = vpop.f32.mrf.mxu2 }
 0x396   : > { %v2128_v55 = vadd.f32 %v2127_v54, %v2062_v27  ;;  %v2243_v56 = vpop.f32.mrf.mxu0 }
 0x397   : > { %v2358_v2 = vadd.f32 %v3789_v38, %v2338_v42 }
 0x398   : > { %2304 = vrot.lane.b32.xlu0 %v2128_v55, %s2966_s9  ;;  %v2131_v27 = vpop.f32.mrf.mxu3  ;;  %s2779_s9 = sshll.u32 %s2946_s24, 4  ;;  %s2422_s24 = sshll.u32 %s3388_s19, 4  ;;  %s2423_s24 = int_to_ptr.vmem [resolvable:$true] %s2422_s24 }
 0x399   : > { %v2374_v59 = vmax.f32 %v2358_v2, 0.0  ;;  %s2419_s20 = sadd.s32 %s2779_s9, %s2732_s13 }
 0x39a   : > { %v2277_v0 = vpop.permute.xlu1 %2276  ;;  %s2733_s14 = sshll.u32 %s2419_s20, 3  ;;  %s2888_s20 = scalar_lea.hbm %s3909_s6, 512 }
 0x39b   : > { %2390 = vst.msk [vmem:[%s3388_s19] sm:$0xff] %vm1777_vm9, %v2374_v59  ;;  %v2323_v7 = vadd.f32 %v2277_v0, %v3714_v24  ;;  %v2184_v54 = vpop.f32.mrf.mxu1  ;;  %v2236_v59 = vadd.f32 %v2235_v10, %v2174_v61  ;;  %s2421_s18 = scalar_lea.hbm %s3909_s6, %s2733_s14 }
 0x39c   : > { %s2424_s25 = sshll.u32 %s2421_s18, 4  ;;  %s2425_s25 = int_to_ptr.hbm [resolvable:$true] %s2424_s25 }
 0x39d   : > { %v2339_v20 = vadd.f32 %v2323_v7, %v2221_v48  ;;  %s2882_s12 = sshra.s32 %s2425_s25, 4  ;;  %s2883_s12 = int_to_ptr.hbm [resolvable:$true] %s2882_s12 }
 0x39e   : > { %v2245_v55 = vpop.f32.mrf.mxu0  ;;  %s2884_s29 = scalar_lea.hbm %s2883_s12, 128  ;;  %p2889_p7 = scmp.lt.s32.totalorder %s2883_s12, %s3909_s6 }
 0x39f   : > { %v2359_v58 = vadd.f32 %v3789_v38, %v2339_v20  ;;  %p2885_p4 = scmp.ne.s32.totalorder %s2883_s12, %s2884_s29  ;;  %p2890_p9 = scmp.lt.s32.totalorder %s2888_s20, %s2884_s29 }
 0x3a0   : > { %v2133_v20 = vpop.f32.mrf.mxu3 }
 0x3a1   : > { %v2375_v8 = vmax.f32 %v2359_v58, 0.0  ;;  %p2886_p5 = pnand %p2885_p4, %p3055_p3  ;;  %p2891_p10 = por %p2890_p9, %p2889_p7 }
 0x3a2   : > { %v2285_v15 = vpop.permute.xlu2 %2284 }
 0x3a3   : > { %2391 = vst.msk [vmem:[%s3388_s19 + $0x8] sm:$0xff] %vm1777_vm9, %v2375_v8  ;;  %v2327_v18 = vadd.f32 %v2285_v15, %v3726_v40  ;;  %v2187_v48 = vpop.f32.mrf.mxu1  ;;  %v2246_v15 = vadd.f32 %v2245_v55, %v2184_v54  ;;  %p2887_p6 = pneg %p2886_p5 }
 0x3a5   : > { %v2343_v19 = vadd.f32 %v2327_v18, %v2231_v3  ;;  %p2892_p11 = pnand %p2891_p10, %p2887_p6 }
 0x3a6   : > { %v2248_v8 = vpop.f32.mrf.mxu0 }
 0x3a7   : > { %v2363_v4 = vadd.f32 %v3789_v38, %v2343_v19 }
 0x3a8   : > { %v2134_v19 = vpop.f32.mrf.mxu3 }
 0x3a9   : > { %v2379_v11 = vmax.f32 %v2363_v4, 0.0 }
 0x3aa   : > { %v2281_v24 = vpop.permute.xlu0 %2280 }
 0x3ab   : > { %2395 = vst.msk [vmem:[%s3388_s19 + $0x28] sm:$0xff] %vm1777_vm9, %v2379_v11  ;;  %v2325_v23 = vadd.f32 %v2281_v24, %v3720_v30  ;;  %v2241_v11 = vadd.f32 %v2240_v34, %v2179_v36 }
 0x3ad   : > { %v2341_v13 = vadd.f32 %v2325_v23, %v2226_v57  ;;  %v2189_v57 = vpop.f32.mrf.mxu1 }
 0x3ae   : > { %v2250_v24 = vpop.f32.mrf.mxu0 }
 0x3af   : > { %v2361_v28 = vadd.f32 %v3789_v38, %v2341_v13 }
 0x3b1   : > { %v2377_v62 = vmax.f32 %v2361_v28, 0.0  ;;  %v2244_v28 = vadd.f32 %v2243_v56, %v2182_v45 }
 0x3b2   : > { %v2283_v41 = vpop.permute.xlu1 %2282 }
 0x3b3   : > { %2393 = vst.msk [vmem:[%s3388_s19 + $0x18] sm:$0xff] %vm1777_vm9, %v2377_v62  ;;  %v2326_v40 = vadd.f32 %v2283_v41, %v3722_v32  ;;  %v2065_v32 = vpop.f32.mrf.mxu2 }
 0x3b4   : > { %v2251_v32 = vadd.f32 %v2250_v24, %v2189_v57 }
 0x3b5   : > { %v2342_v16 = vadd.f32 %v2326_v40, %v2229_v6  ;;  %v2192_v6 = vpop.f32.mrf.mxu1 }
 0x3b6   : > { %v2253_v40 = vpop.f32.mrf.mxu0 }
 0x3b7   : > { %v2362_v21 = vadd.f32 %v3789_v38, %v2342_v16  ;;  %v2254_v16 = vadd.f32 %v2253_v40, %v2192_v6 }
 0x3b9   : > { %v2378_v26 = vmax.f32 %v2362_v21, 0.0 }
 0x3ba   : > { %v2291_v30 = vpop.permute.xlu2 %2290 }
 0x3bb   : > { %2394 = vst.msk [vmem:[%s3388_s19 + $0x20] sm:$0xff] %vm1777_vm9, %v2378_v26  ;;  %v2330_v44 = vadd.f32 %v2291_v30, %v3744_v35  ;;  %v2066_v42 = vpop.f32.mrf.mxu2 }
 0x3bd   : > { %v2346_v47 = vadd.f32 %v2330_v44, %v2239_v31  ;;  %v2249_v31 = vadd.f32 %v2248_v8, %v2187_v48 }
 0x3bf   : > { %v2366_v29 = vadd.f32 %v3789_v38, %v2346_v47 }
 0x3c1   : > { %v2382_v46 = vmax.f32 %v2366_v29, 0.0 }
 0x3c2   : > { %v2287_v49 = vpop.permute.xlu0 %2286 }
 0x3c3   : > { %2398 = vst.msk [vmem:[%s3388_s19 + $0x40] sm:$0xff] %vm1777_vm9, %v2382_v46  ;;  %v2328_v51 = vadd.f32 %v2287_v49, %v3730_v39  ;;  %v2068_v7 = vpop.f32.mrf.mxu2 }
 0x3c5   : > { %v2344_v52 = vadd.f32 %v2328_v51, %v2234_v50  ;;  %v2255_v51 = vpop.f32.mrf.mxu0 }
 0x3c7   : > { %v2364_v53 = vadd.f32 %v3789_v38, %v2344_v52 }
 0x3c9   : > { %v2380_v35 = vmax.f32 %v2364_v53, 0.0 }
 0x3ca   : > { %v2289_v2 = vpop.permute.xlu1 %2288 }
 0x3cb   : > { %2396 = vst.msk [vmem:[%s3388_s19 + $0x30] sm:$0xff] %vm1777_vm9, %v2380_v35  ;;  %v2329_v0 = vadd.f32 %v2289_v2, %v3734_v37  ;;  %v2069_v18 = vpop.f32.mrf.mxu2 }
 0x3cd   : > { %v2345_v14 = vadd.f32 %v2329_v0, %v2236_v59 }
 0x3cf   : > { %v2365_v5 = vadd.f32 %v3789_v38, %v2345_v14 }
 0x3d1   : > { %v2381_v39 = vmax.f32 %v2365_v5, 0.0 }
 0x3d2   : > { %v2297_v58 = vpop.permute.xlu2 %2296 }
 0x3d3   : > { %2397 = vst.msk [vmem:[%s3388_s19 + $0x38] sm:$0xff] %vm1777_vm9, %v2381_v39  ;;  %v2333_v3 = vadd.f32 %v2297_v58, %v3764_v9 }
 0x3d5   : > { %v2349_v61 = vadd.f32 %v2333_v3, %v2246_v15 }
 0x3d7   : > { %v2369_v10 = vadd.f32 %v3789_v38, %v2349_v61 }
 0x3d9   : > { %v2385_v37 = vmax.f32 %v2369_v10, 0.0 }
 0x3da   : > { %v2293_v4 = vpop.permute.xlu0 %2292 }
 0x3db   : > { %2401 = vst.msk [vmem:[%s3388_s19 + $0x58] sm:$0xff] %vm1777_vm9, %v2385_v37  ;;  %v2331_v33 = vadd.f32 %v2293_v4, %v3749_v1 }
 0x3dd   : > { %v2347_v23 = vadd.f32 %v2331_v33, %v2241_v11 }
 0x3df   : > { %v2367_v25 = vadd.f32 %v3789_v38, %v2347_v23 }
 0x3e1   : > { %v2383_v9 = vmax.f32 %v2367_v25, 0.0 }
 0x3e2   : > { %v2295_v13 = vpop.permute.xlu1 %2294 }
 0x3e3   : > { %2399 = vst.msk [vmem:[%s3388_s19 + $0x48] sm:$0xff] %vm1777_vm9, %v2383_v9  ;;  %v2332_v62 = vadd.f32 %v2295_v13, %v3759_v60 }
 0x3e5   : > { %v2348_v41 = vadd.f32 %v2332_v62, %v2244_v28 }
 0x3e7   : > { %v2368_v36 = vadd.f32 %v3789_v38, %v2348_v41 }
 0x3e9   : > { %v2384_v1 = vmax.f32 %v2368_v36, 0.0 }
 0x3ea   : > { %v2303_v34 = vpop.permute.xlu2 %2302 }
 0x3eb   : > { %2400 = vst.msk [vmem:[%s3388_s19 + $0x50] sm:$0xff] %vm1777_vm9, %v2384_v1  ;;  %v2336_v21 = vadd.f32 %v2303_v34, %v3776_v22 }
 0x3ed   : > { %v2352_v26 = vadd.f32 %v2336_v21, %v2254_v16 }
 0x3ef   : > { %v2372_v30 = vadd.f32 %v3789_v38, %v2352_v26 }
 0x3f1   : > { %v2388_v60 = vmax.f32 %v2372_v30, 0.0 }
 0x3f2   : > { %v2299_v44 = vpop.permute.xlu0 %2298 }
 0x3f3   : > { %2404 = vst.msk [vmem:[%s3388_s19 + $0x70] sm:$0xff] %vm1777_vm9, %v2388_v60  ;;  %v2334_v47 = vadd.f32 %v2299_v44, %v3768_v12  ;;  %v2194_v12 = vpop.f32.mrf.mxu1 }
 0x3f5   : > { %v2350_v45 = vadd.f32 %v2334_v47, %v2249_v31 }
 0x3f7   : > { %v2370_v29 = vadd.f32 %v3789_v38, %v2350_v45 }
 0x3f9   : > { %v2386_v56 = vmax.f32 %v2370_v29, 0.0 }
 0x3fa   : > { %v2301_v46 = vpop.permute.xlu1 %2300 }
 0x3fb   : > { %2402 = vst.msk [vmem:[%s3388_s19 + $0x60] sm:$0xff] %vm1777_vm9, %v2386_v56  ;;  %v2335_v22 = vadd.f32 %v2301_v46, %v3772_v17  ;;  %v2256_v17 = vadd.f32 %v2255_v51, %v2194_v12 }
 0x3fd   : > { %v2351_v63 = vadd.f32 %v2335_v22, %v2251_v32 }
 0x3ff   : > { %v2371_v49 = vadd.f32 %v3789_v38, %v2351_v63 }
 0x401   : > { %v2387_v50 = vmax.f32 %v2371_v49, 0.0 }
 0x403   : > { %2403 = vst.msk [vmem:[%s3388_s19 + $0x68] sm:$0xff] %vm1777_vm9, %v2387_v50 }
 0x40a   : > { %v2305_v52 = vpop.permute.xlu0 %2304 }
 0x40b   : > { %v2337_v53 = vadd.f32 %v2305_v52, %v3780_v43 }
 0x40d   : > { %v2353_v54 = vadd.f32 %v2337_v53, %v2256_v17 }
 0x40f   : > { %v2373_v35 = vadd.f32 %v3789_v38, %v2353_v54 }
 0x411   : > { %v2389_v42 = vmax.f32 %v2373_v35, 0.0 }
 0x413   : > { %2405 = vst.msk [vmem:[%s3388_s19 + $0x78] sm:$0xff] %vm1777_vm9, %v2389_v42 }
 0x414   : > { %2895 = shalt.err (!%p2892_p11)
}
 0x415   : > { %s2967_s19 = smov 128   ;;  %s2968_s17 = smov 8  }
 0x416   : > { %2789 = dma.vmem_to_hbm [thread:$0]  (%p3055_p3), %s2423_s24, 2048, %s2425_s25, %s2407_s30, %s2967_s19, %s2967_s19, %s2968_s17  }
 0x417 PF: > { %p2795_p12 = scmp.ge.s32.totalorder %s2962_s28, 2  ;;  %s2439_s18 = sand.u32 1, %s2934_s21  }
 0x418   : > { %s2440_s16 = scalar_lea.sflag [#allocation4], %s2439_s18 }
 0x419   : > { %p2792_p13 = pnand %p2795_p12, %p3064_p8 }
 0x41b   : > { %p2793_p0 = pneg %p2792_p13 }
 0x41d   : > { %2929 = dma.done.wait (%p2793_p0), %s2440_s16, 2048  }
 0x41e   : > { %2931 = vsyncadd (%p2793_p0), %s2440_s16, 4294965248  ;;  %s19_s28 = sadd.s32 1, %s2962_s28   ;;  %s3917_s21 = smov %s2938_s22 }
 0x41f   : > { %p16_p1 = scmp.ge.s32.totalorder %s19_s28, 6   ;;  %s3918_s22 = smov %s2942_s23 }
 0x420   : > { %s3919_s23 = smov %s3073_s15  ;;  %s3920_s24 = smov %s2954_s26 }
 0x421   : > { %s3921_s25 = smov %s2958_s27  ;;  %s3922_s26 = smov %s3925_s7 }
 0x422   : > { %s3923_s27 = smov %s3929_s8  ;;  %18 = sbr.rel (!%p16_p1) target bundleno = 7 (0x7), region = 134 }
 0x427   :  { %2446 = vsyncpa [#allocation4], 1 }
 0x428   :  { %2448 = vsyncpa [#allocation4 + $0x1], 1 }

</bundles_post_ra>
